<compile_context>
chip_gen: v7x
topology: tpu7x:2x2x1
jax: 0.10.0
libtpu: 0.0.40
codegen_flags: <defaults>
</compile_context>

<pallas_src>
import functools

import jax
import jax.numpy as jnp
from jax.experimental import pallas as pl
from jax.experimental.pallas import tpu as pltpu


def _isa_kernel(x_ref, wqkv_ref, bqkv_ref, red_ref, exp_ref, wp_ref, bp_ref,
                o_ref, *, C, H, N):
    """One block of Gb groups, processed as a lane-dense (Gb, N*C) slab."""
    NC = N * C
    f32 = jnp.float32
    bf16 = jnp.bfloat16

    # ---- QKV linear (block-diagonal weights keep the (Gb, N*C) layout) ------
    xb = x_ref[...].astype(bf16)                                    # (Gb, NC)
    qkv = jnp.dot(xb, wqkv_ref[...], preferred_element_type=f32)    # (Gb, 3NC)
    qkv = qkv + bqkv_ref[...]
    # Splits at multiples of NC=256 lanes -> vreg-aligned, free views.
    q = qkv[:, 0 * NC:1 * NC]
    k = qkv[:, 1 * NC:2 * NC]
    v = qkv[:, 2 * NC:3 * NC]

    red = red_ref[...]        # (NC, N*H)  0/1: sums the d lanes of each (n, h)
    exp_map = exp_ref[...]    # (N*H, NC)  0/1: repeats each (n, h) over d lanes

    # ---- scores: for offset r, s_r[g,(n,h)] = <q[g,n,h,:], k[g,m_r(n),h,:]> --
    # m_r(n) = (n +/- r) mod N (sign = roll convention).  It is a bijection in
    # r for every n, and k/v use the same rotation, so the result is exact.
    s_list = []
    for r in range(N):
        k_r = k if r == 0 else pltpu.roll(k, shift=r * C, axis=1)
        prod = (q * k_r).astype(bf16)                               # (Gb, NC)
        s_list.append(jnp.dot(prod, red, preferred_element_type=f32))  # (Gb, N*H)

    # ---- softmax over keys (== softmax over r) -------------------------------
    m = s_list[0]
    for s in s_list[1:]:
        m = jnp.maximum(m, s)
    e_list = [jnp.exp(s - m) for s in s_list]
    denom = e_list[0]
    for e in e_list[1:]:
        denom = denom + e
    inv = pl.reciprocal(denom, approx=True)                         # EUP

    # ---- attention @ V, accumulated directly in the (Gb, N*C) output layout --
    av = None
    for r in range(N):
        p_r = (e_list[r] * inv).astype(bf16)                        # (Gb, N*H)
        p_full = jnp.dot(p_r, exp_map, preferred_element_type=f32)  # (Gb, NC)
        v_r = v if r == 0 else pltpu.roll(v, shift=r * C, axis=1)
        term = p_full * v_r
        av = term if av is None else av + term

    # ---- output projection (block-diagonal) + bias; lane-dense store ---------
    out = jnp.dot(av.astype(bf16), wp_ref[...], preferred_element_type=f32)
    out = out + bp_ref[...]
    o_ref[...] = out.astype(o_ref.dtype)


def _tensorcores_per_chip():
    """Best-effort: v7x exposes 2 TensorCores per chip, older gens 1."""
    try:
        kind = jax.devices()[0].device_kind.lower()
        if "v7" in kind or "7x" in kind:
            return 2
    except Exception:
        pass
    return 1


def _choose_blocking(G, N, target_rows):
    groups_target = max(8, target_rows // max(N, 1))
    num_blocks = max(1, -(-G // groups_target))
    # Splitting a single resident block in two only pays on multi-TC chips.
    if num_blocks == 1 and G >= 16 and _tensorcores_per_chip() >= 2:
        num_blocks = 2
    Gb = -(-G // num_blocks)
    if num_blocks > 1:
        Gb = -(-Gb // 8) * 8          # keep the sublane (second-minor) dim 8-aligned
    return Gb, num_blocks, Gb * num_blocks


def inter_scale_attention(x, wqkv, bqkv, wp, bp, *, num_head=8,
                          target_rows=4096):
    """x: (B, nd, nh, nw, N, C) float32 -> same shape.

    wqkv: (C, 3C), bqkv: (3C,), wp: (C, C), bp: (C,) in the `x @ W + b`
    convention (transpose of the nn.Linear weight layout).
    """
    B, nd, nh, nw, N, C = x.shape
    H = num_head
    assert C % H == 0
    d = C // H
    NC = N * C
    G = B * nd * nh * nw

    f32 = jnp.float32
    bf16 = jnp.bfloat16

    # ---- parameter prep (tiny, shared across all blocks) ---------------------
    eye_n = jnp.eye(N, dtype=f32)

    def blk(w):                         # (C, C) -> block-diagonal (NC, NC)
        return jnp.kron(eye_n, w.astype(f32))

    wq, wk, wv = wqkv[:, :C], wqkv[:, C:2 * C], wqkv[:, 2 * C:]
    wqkv_blk = jnp.concatenate([blk(wq), blk(wk), blk(wv)], axis=1).astype(bf16)
    wp_blk = blk(wp).astype(bf16)

    bq, bk, bv = bqkv[:C], bqkv[C:2 * C], bqkv[2 * C:]
    bqkv_rep = jnp.concatenate(
        [jnp.tile(bq, N), jnp.tile(bk, N), jnp.tile(bv, N)]
    ).reshape(1, 3 * NC).astype(f32)
    bp_rep = jnp.tile(bp, N).reshape(1, NC).astype(f32)

    # 0/1 head-segment matrices (exact in bf16): reduce the d lanes of each
    # (n, h) and expand an (n, h) value back over its d lanes.
    red = jnp.kron(jnp.eye(N * H, dtype=f32), jnp.ones((d, 1), f32))  # (NC, N*H)
    exp_map = red.T                                                   # (N*H, NC)
    red = red.astype(bf16)
    exp_map = exp_map.astype(bf16)

    # ---- blocking: lane-dense slabs, pad G up instead of shrinking the block -
    Gb, num_blocks, G_pad = _choose_blocking(G, N, target_rows)
    xf = x.reshape(G, NC)
    if G_pad != G:
        xf = jnp.pad(xf, ((0, G_pad - G), (0, 0)))   # zero pad: softmax stays finite

    kernel = functools.partial(_isa_kernel, C=C, H=H, N=N)

    out = pl.pallas_call(
        kernel,
        out_shape=jax.ShapeDtypeStruct((G_pad, NC), x.dtype),
        grid=(num_blocks,),
        in_specs=[
            pl.BlockSpec((Gb, NC), lambda g: (g, 0)),          # x slab
            pl.BlockSpec((NC, 3 * NC), lambda g: (0, 0)),      # W_qkv blockdiag
            pl.BlockSpec((1, 3 * NC), lambda g: (0, 0)),       # b_qkv (tiled)
            pl.BlockSpec((NC, N * H), lambda g: (0, 0)),       # head reduce map
            pl.BlockSpec((N * H, NC), lambda g: (0, 0)),       # head expand map
            pl.BlockSpec((NC, NC), lambda g: (0, 0)),          # W_proj blockdiag
            pl.BlockSpec((1, NC), lambda g: (0, 0)),           # b_proj (tiled)
        ],
        out_specs=pl.BlockSpec((Gb, NC), lambda g: (g, 0)),
        compiler_params=pltpu.CompilerParams(
            dimension_semantics=("parallel",),
            vmem_limit_bytes=32 * 1024 * 1024),
    )(xf, wqkv_blk, bqkv_rep, red, exp_map, wp_blk, bp_rep)

    if G_pad != G:
        out = out[:G]
    return out.reshape(B, nd, nh, nw, N, C)


def _reference(x, wqkv, bqkv, wp, bp, num_head=8):
    """Pure-JAX mirror of the PyTorch forward (for validation)."""
    B, nd, nh, nw, N, C = x.shape
    d = C // num_head
    qkv = x @ wqkv + bqkv                                   # (..., N, 3C)
    qkv = qkv.reshape(B, nd, nh, nw, N, 3, num_head, d)
    qkv = jnp.transpose(qkv, (5, 0, 1, 2, 3, 6, 4, 7))      # (3,B,nd,nh,nw,H,N,d)
    q, k, v = qkv[0], qkv[1], qkv[2]
    atten = q @ jnp.swapaxes(k, -1, -2)                     # (..., H, N, N)
    atten = jax.nn.softmax(atten, axis=-1)
    av = atten @ v                                          # (..., H, N, d)
    av = jnp.swapaxes(av, -2, -3).reshape(B, nd, nh, nw, N, C)
    return av @ wp + bp


if __name__ == "__main__":
    # Small shapes consistent with the module: dim C must be divisible by 8.
    B, nd, nh, nw, N, C = 2, 2, 2, 2, 8, 32
    key = jax.random.PRNGKey(0)
    kx, kw1, kb1, kw2, kb2 = jax.random.split(key, 5)

    x = jax.random.normal(kx, (B, nd, nh, nw, N, C), dtype=jnp.float32)
    # Synthetic parameters (nn.Linear(dim, 3*dim) / nn.Linear(dim, dim)).
    wqkv = jax.random.normal(kw1, (C, 3 * C), dtype=jnp.float32) * 0.05
    bqkv = jax.random.normal(kb1, (3 * C,), dtype=jnp.float32) * 0.05
    wp = jax.random.normal(kw2, (C, C), dtype=jnp.float32) * 0.05
    bp = jax.random.normal(kb2, (C,), dtype=jnp.float32) * 0.05

    out = inter_scale_attention(x, wqkv, bqkv, wp, bp, num_head=8)
    out = jax.block_until_ready(out)

    ref = _reference(x, wqkv, bqkv, wp, bp, num_head=8)
    assert out.shape == (B, nd, nh, nw, N, C)
    # bf16 MXU inputs + EUP approximate reciprocal -> relaxed tolerance.
    assert jnp.allclose(out, ref, rtol=2e-2, atol=3e-3), (
        "mismatch vs reference, max abs err = "
        + str(float(jnp.max(jnp.abs(out - ref)))))

    print("KERNEL_OK")
</pallas_src>

<mosaic_0001>
module attributes {stable_mosaic.version = 11 : i64} {
  func.func @_isa_kernel(%arg0: i32, %arg1: memref<16x256xf32, #tpu.memory_space<vmem>>, %arg2: memref<256x768xbf16, #tpu.memory_space<vmem>>, %arg3: memref<1x768xf32, #tpu.memory_space<vmem>>, %arg4: memref<256x64xbf16, #tpu.memory_space<vmem>>, %arg5: memref<64x256xbf16, #tpu.memory_space<vmem>>, %arg6: memref<256x256xbf16, #tpu.memory_space<vmem>>, %arg7: memref<1x256xf32, #tpu.memory_space<vmem>>, %arg8: memref<16x256xf32, #tpu.memory_space<vmem>>) attributes {dimension_semantics = [#tpu.dimension_semantics<parallel>], iteration_bounds = array<i64: 1>, scalar_prefetch = 0 : i64, scratch_operands = 0 : i64, tpu.core_type = #tpu.core_type<tc>, window_params = [{transform_indices = @transform_0, window_bounds = array<i64: 16, 256>}, {pipeline_mode = #tpu.pipeline_mode<synchronous>, transform_indices = @transform_1, window_bounds = array<i64: 256, 768>}, {pipeline_mode = #tpu.pipeline_mode<synchronous>, transform_indices = @transform_2, window_bounds = array<i64: 1, 768>}, {pipeline_mode = #tpu.pipeline_mode<synchronous>, transform_indices = @transform_3, window_bounds = array<i64: 256, 64>}, {pipeline_mode = #tpu.pipeline_mode<synchronous>, transform_indices = @transform_4, window_bounds = array<i64: 64, 256>}, {pipeline_mode = #tpu.pipeline_mode<synchronous>, transform_indices = @transform_5, window_bounds = array<i64: 256, 256>}, {pipeline_mode = #tpu.pipeline_mode<synchronous>, transform_indices = @transform_6, window_bounds = array<i64: 1, 256>}, {transform_indices = @transform_7, window_bounds = array<i64: 16, 256>}]} {
    %c0 = arith.constant 0 : index
    %c0_0 = arith.constant 0 : index
    %0 = vector.load %arg1[%c0, %c0_0] : memref<16x256xf32, #tpu.memory_space<vmem>>, vector<16x256xf32>
    %1 = arith.truncf %0 : vector<16x256xf32> to vector<16x256xbf16>
    %c0_1 = arith.constant 0 : index
    %c0_2 = arith.constant 0 : index
    %2 = vector.load %arg2[%c0_1, %c0_2] : memref<256x768xbf16, #tpu.memory_space<vmem>>, vector<256x768xbf16>
    %cst = arith.constant dense<0.000000e+00> : vector<16x768xf32>
    %3 = tpu.matmul %1, %2, %cst {dimension_numbers = #tpu.dot_dimension_numbers<[1], [0], [0], [1], [0, 0, 1, 1], [], []>} : vector<16x256xbf16>, vector<256x768xbf16>, vector<16x768xf32> -> vector<16x768xf32>
    %c0_3 = arith.constant 0 : index
    %c0_4 = arith.constant 0 : index
    %4 = vector.load %arg3[%c0_3, %c0_4] : memref<1x768xf32, #tpu.memory_space<vmem>>, vector<1x768xf32>
    %5 = vector.broadcast %4 : vector<1x768xf32> to vector<16x768xf32>
    %6 = arith.addf %3, %5 : vector<16x768xf32>
    %7 = vector.extract_strided_slice %6 {offsets = [0, 0], sizes = [16, 256], strides = [1, 1]} : vector<16x768xf32> to vector<16x256xf32>
    %8 = vector.extract_strided_slice %6 {offsets = [0, 256], sizes = [16, 256], strides = [1, 1]} : vector<16x768xf32> to vector<16x256xf32>
    %9 = vector.extract_strided_slice %6 {offsets = [0, 512], sizes = [16, 256], strides = [1, 1]} : vector<16x768xf32> to vector<16x256xf32>
    %c0_5 = arith.constant 0 : index
    %c0_6 = arith.constant 0 : index
    %10 = vector.load %arg4[%c0_5, %c0_6] : memref<256x64xbf16, #tpu.memory_space<vmem>>, vector<256x64xbf16>
    %c0_7 = arith.constant 0 : index
    %c0_8 = arith.constant 0 : index
    %11 = vector.load %arg5[%c0_7, %c0_8] : memref<64x256xbf16, #tpu.memory_space<vmem>>, vector<64x256xbf16>
    %12 = arith.mulf %7, %8 : vector<16x256xf32>
    %13 = arith.truncf %12 : vector<16x256xf32> to vector<16x256xbf16>
    %cst_9 = arith.constant dense<0.000000e+00> : vector<16x64xf32>
    %14 = tpu.matmul %13, %10, %cst_9 {dimension_numbers = #tpu.dot_dimension_numbers<[1], [0], [0], [1], [0, 0, 1, 1], [], []>} : vector<16x256xbf16>, vector<256x64xbf16>, vector<16x64xf32> -> vector<16x64xf32>
    %c32_i32 = arith.constant 32 : i32
    %15 = tpu.dynamic_rotate %8 by %c32_i32 dim 1 : vector<16x256xf32>, i32 -> vector<16x256xf32>
    %16 = arith.mulf %7, %15 : vector<16x256xf32>
    %17 = arith.truncf %16 : vector<16x256xf32> to vector<16x256xbf16>
    %cst_10 = arith.constant dense<0.000000e+00> : vector<16x64xf32>
    %18 = tpu.matmul %17, %10, %cst_10 {dimension_numbers = #tpu.dot_dimension_numbers<[1], [0], [0], [1], [0, 0, 1, 1], [], []>} : vector<16x256xbf16>, vector<256x64xbf16>, vector<16x64xf32> -> vector<16x64xf32>
    %c64_i32 = arith.constant 64 : i32
    %19 = tpu.dynamic_rotate %8 by %c64_i32 dim 1 : vector<16x256xf32>, i32 -> vector<16x256xf32>
    %20 = arith.mulf %7, %19 : vector<16x256xf32>
    %21 = arith.truncf %20 : vector<16x256xf32> to vector<16x256xbf16>
    %cst_11 = arith.constant dense<0.000000e+00> : vector<16x64xf32>
    %22 = tpu.matmul %21, %10, %cst_11 {dimension_numbers = #tpu.dot_dimension_numbers<[1], [0], [0], [1], [0, 0, 1, 1], [], []>} : vector<16x256xbf16>, vector<256x64xbf16>, vector<16x64xf32> -> vector<16x64xf32>
    %c96_i32 = arith.constant 96 : i32
    %23 = tpu.dynamic_rotate %8 by %c96_i32 dim 1 : vector<16x256xf32>, i32 -> vector<16x256xf32>
    %24 = arith.mulf %7, %23 : vector<16x256xf32>
    %25 = arith.truncf %24 : vector<16x256xf32> to vector<16x256xbf16>
    %cst_12 = arith.constant dense<0.000000e+00> : vector<16x64xf32>
    %26 = tpu.matmul %25, %10, %cst_12 {dimension_numbers = #tpu.dot_dimension_numbers<[1], [0], [0], [1], [0, 0, 1, 1], [], []>} : vector<16x256xbf16>, vector<256x64xbf16>, vector<16x64xf32> -> vector<16x64xf32>
    %c128_i32 = arith.constant 128 : i32
    %27 = tpu.dynamic_rotate %8 by %c128_i32 dim 1 : vector<16x256xf32>, i32 -> vector<16x256xf32>
    %28 = arith.mulf %7, %27 : vector<16x256xf32>
    %29 = arith.truncf %28 : vector<16x256xf32> to vector<16x256xbf16>
    %cst_13 = arith.constant dense<0.000000e+00> : vector<16x64xf32>
    %30 = tpu.matmul %29, %10, %cst_13 {dimension_numbers = #tpu.dot_dimension_numbers<[1], [0], [0], [1], [0, 0, 1, 1], [], []>} : vector<16x256xbf16>, vector<256x64xbf16>, vector<16x64xf32> -> vector<16x64xf32>
    %c160_i32 = arith.constant 160 : i32
    %31 = tpu.dynamic_rotate %8 by %c160_i32 dim 1 : vector<16x256xf32>, i32 -> vector<16x256xf32>
    %32 = arith.mulf %7, %31 : vector<16x256xf32>
    %33 = arith.truncf %32 : vector<16x256xf32> to vector<16x256xbf16>
    %cst_14 = arith.constant dense<0.000000e+00> : vector<16x64xf32>
    %34 = tpu.matmul %33, %10, %cst_14 {dimension_numbers = #tpu.dot_dimension_numbers<[1], [0], [0], [1], [0, 0, 1, 1], [], []>} : vector<16x256xbf16>, vector<256x64xbf16>, vector<16x64xf32> -> vector<16x64xf32>
    %c192_i32 = arith.constant 192 : i32
    %35 = tpu.dynamic_rotate %8 by %c192_i32 dim 1 : vector<16x256xf32>, i32 -> vector<16x256xf32>
    %36 = arith.mulf %7, %35 : vector<16x256xf32>
    %37 = arith.truncf %36 : vector<16x256xf32> to vector<16x256xbf16>
    %cst_15 = arith.constant dense<0.000000e+00> : vector<16x64xf32>
    %38 = tpu.matmul %37, %10, %cst_15 {dimension_numbers = #tpu.dot_dimension_numbers<[1], [0], [0], [1], [0, 0, 1, 1], [], []>} : vector<16x256xbf16>, vector<256x64xbf16>, vector<16x64xf32> -> vector<16x64xf32>
    %c224_i32 = arith.constant 224 : i32
    %39 = tpu.dynamic_rotate %8 by %c224_i32 dim 1 : vector<16x256xf32>, i32 -> vector<16x256xf32>
    %40 = arith.mulf %7, %39 : vector<16x256xf32>
    %41 = arith.truncf %40 : vector<16x256xf32> to vector<16x256xbf16>
    %cst_16 = arith.constant dense<0.000000e+00> : vector<16x64xf32>
    %42 = tpu.matmul %41, %10, %cst_16 {dimension_numbers = #tpu.dot_dimension_numbers<[1], [0], [0], [1], [0, 0, 1, 1], [], []>} : vector<16x256xbf16>, vector<256x64xbf16>, vector<16x64xf32> -> vector<16x64xf32>
    %43 = arith.maximumf %14, %18 : vector<16x64xf32>
    %44 = arith.maximumf %43, %22 : vector<16x64xf32>
    %45 = arith.maximumf %44, %26 : vector<16x64xf32>
    %46 = arith.maximumf %45, %30 : vector<16x64xf32>
    %47 = arith.maximumf %46, %34 : vector<16x64xf32>
    %48 = arith.maximumf %47, %38 : vector<16x64xf32>
    %49 = arith.maximumf %48, %42 : vector<16x64xf32>
    %50 = arith.subf %14, %49 : vector<16x64xf32>
    %51 = math.exp %50 : vector<16x64xf32>
    %52 = arith.subf %18, %49 : vector<16x64xf32>
    %53 = math.exp %52 : vector<16x64xf32>
    %54 = arith.subf %22, %49 : vector<16x64xf32>
    %55 = math.exp %54 : vector<16x64xf32>
    %56 = arith.subf %26, %49 : vector<16x64xf32>
    %57 = math.exp %56 : vector<16x64xf32>
    %58 = arith.subf %30, %49 : vector<16x64xf32>
    %59 = math.exp %58 : vector<16x64xf32>
    %60 = arith.subf %34, %49 : vector<16x64xf32>
    %61 = math.exp %60 : vector<16x64xf32>
    %62 = arith.subf %38, %49 : vector<16x64xf32>
    %63 = math.exp %62 : vector<16x64xf32>
    %64 = arith.subf %42, %49 : vector<16x64xf32>
    %65 = math.exp %64 : vector<16x64xf32>
    %66 = arith.addf %51, %53 : vector<16x64xf32>
    %67 = arith.addf %66, %55 : vector<16x64xf32>
    %68 = arith.addf %67, %57 : vector<16x64xf32>
    %69 = arith.addf %68, %59 : vector<16x64xf32>
    %70 = arith.addf %69, %61 : vector<16x64xf32>
    %71 = arith.addf %70, %63 : vector<16x64xf32>
    %72 = arith.addf %71, %65 : vector<16x64xf32>
    %73 = tpu.reciprocal %72 {approx = true} : vector<16x64xf32> -> vector<16x64xf32>
    %74 = arith.mulf %51, %73 : vector<16x64xf32>
    %75 = arith.truncf %74 : vector<16x64xf32> to vector<16x64xbf16>
    %cst_17 = arith.constant dense<0.000000e+00> : vector<16x256xf32>
    %76 = tpu.matmul %75, %11, %cst_17 {dimension_numbers = #tpu.dot_dimension_numbers<[1], [0], [0], [1], [0, 0, 1, 1], [], []>} : vector<16x64xbf16>, vector<64x256xbf16>, vector<16x256xf32> -> vector<16x256xf32>
    %77 = arith.mulf %76, %9 : vector<16x256xf32>
    %78 = arith.mulf %53, %73 : vector<16x64xf32>
    %79 = arith.truncf %78 : vector<16x64xf32> to vector<16x64xbf16>
    %cst_18 = arith.constant dense<0.000000e+00> : vector<16x256xf32>
    %80 = tpu.matmul %79, %11, %cst_18 {dimension_numbers = #tpu.dot_dimension_numbers<[1], [0], [0], [1], [0, 0, 1, 1], [], []>} : vector<16x64xbf16>, vector<64x256xbf16>, vector<16x256xf32> -> vector<16x256xf32>
    %c32_i32_19 = arith.constant 32 : i32
    %81 = tpu.dynamic_rotate %9 by %c32_i32_19 dim 1 : vector<16x256xf32>, i32 -> vector<16x256xf32>
    %82 = arith.mulf %80, %81 : vector<16x256xf32>
    %83 = arith.addf %77, %82 : vector<16x256xf32>
    %84 = arith.mulf %55, %73 : vector<16x64xf32>
    %85 = arith.truncf %84 : vector<16x64xf32> to vector<16x64xbf16>
    %cst_20 = arith.constant dense<0.000000e+00> : vector<16x256xf32>
    %86 = tpu.matmul %85, %11, %cst_20 {dimension_numbers = #tpu.dot_dimension_numbers<[1], [0], [0], [1], [0, 0, 1, 1], [], []>} : vector<16x64xbf16>, vector<64x256xbf16>, vector<16x256xf32> -> vector<16x256xf32>
    %c64_i32_21 = arith.constant 64 : i32
    %87 = tpu.dynamic_rotate %9 by %c64_i32_21 dim 1 : vector<16x256xf32>, i32 -> vector<16x256xf32>
    %88 = arith.mulf %86, %87 : vector<16x256xf32>
    %89 = arith.addf %83, %88 : vector<16x256xf32>
    %90 = arith.mulf %57, %73 : vector<16x64xf32>
    %91 = arith.truncf %90 : vector<16x64xf32> to vector<16x64xbf16>
    %cst_22 = arith.constant dense<0.000000e+00> : vector<16x256xf32>
    %92 = tpu.matmul %91, %11, %cst_22 {dimension_numbers = #tpu.dot_dimension_numbers<[1], [0], [0], [1], [0, 0, 1, 1], [], []>} : vector<16x64xbf16>, vector<64x256xbf16>, vector<16x256xf32> -> vector<16x256xf32>
    %c96_i32_23 = arith.constant 96 : i32
    %93 = tpu.dynamic_rotate %9 by %c96_i32_23 dim 1 : vector<16x256xf32>, i32 -> vector<16x256xf32>
    %94 = arith.mulf %92, %93 : vector<16x256xf32>
    %95 = arith.addf %89, %94 : vector<16x256xf32>
    %96 = arith.mulf %59, %73 : vector<16x64xf32>
    %97 = arith.truncf %96 : vector<16x64xf32> to vector<16x64xbf16>
    %cst_24 = arith.constant dense<0.000000e+00> : vector<16x256xf32>
    %98 = tpu.matmul %97, %11, %cst_24 {dimension_numbers = #tpu.dot_dimension_numbers<[1], [0], [0], [1], [0, 0, 1, 1], [], []>} : vector<16x64xbf16>, vector<64x256xbf16>, vector<16x256xf32> -> vector<16x256xf32>
    %c128_i32_25 = arith.constant 128 : i32
    %99 = tpu.dynamic_rotate %9 by %c128_i32_25 dim 1 : vector<16x256xf32>, i32 -> vector<16x256xf32>
    %100 = arith.mulf %98, %99 : vector<16x256xf32>
    %101 = arith.addf %95, %100 : vector<16x256xf32>
    %102 = arith.mulf %61, %73 : vector<16x64xf32>
    %103 = arith.truncf %102 : vector<16x64xf32> to vector<16x64xbf16>
    %cst_26 = arith.constant dense<0.000000e+00> : vector<16x256xf32>
    %104 = tpu.matmul %103, %11, %cst_26 {dimension_numbers = #tpu.dot_dimension_numbers<[1], [0], [0], [1], [0, 0, 1, 1], [], []>} : vector<16x64xbf16>, vector<64x256xbf16>, vector<16x256xf32> -> vector<16x256xf32>
    %c160_i32_27 = arith.constant 160 : i32
    %105 = tpu.dynamic_rotate %9 by %c160_i32_27 dim 1 : vector<16x256xf32>, i32 -> vector<16x256xf32>
    %106 = arith.mulf %104, %105 : vector<16x256xf32>
    %107 = arith.addf %101, %106 : vector<16x256xf32>
    %108 = arith.mulf %63, %73 : vector<16x64xf32>
    %109 = arith.truncf %108 : vector<16x64xf32> to vector<16x64xbf16>
    %cst_28 = arith.constant dense<0.000000e+00> : vector<16x256xf32>
    %110 = tpu.matmul %109, %11, %cst_28 {dimension_numbers = #tpu.dot_dimension_numbers<[1], [0], [0], [1], [0, 0, 1, 1], [], []>} : vector<16x64xbf16>, vector<64x256xbf16>, vector<16x256xf32> -> vector<16x256xf32>
    %c192_i32_29 = arith.constant 192 : i32
    %111 = tpu.dynamic_rotate %9 by %c192_i32_29 dim 1 : vector<16x256xf32>, i32 -> vector<16x256xf32>
    %112 = arith.mulf %110, %111 : vector<16x256xf32>
    %113 = arith.addf %107, %112 : vector<16x256xf32>
    %114 = arith.mulf %65, %73 : vector<16x64xf32>
    %115 = arith.truncf %114 : vector<16x64xf32> to vector<16x64xbf16>
    %cst_30 = arith.constant dense<0.000000e+00> : vector<16x256xf32>
    %116 = tpu.matmul %115, %11, %cst_30 {dimension_numbers = #tpu.dot_dimension_numbers<[1], [0], [0], [1], [0, 0, 1, 1], [], []>} : vector<16x64xbf16>, vector<64x256xbf16>, vector<16x256xf32> -> vector<16x256xf32>
    %c224_i32_31 = arith.constant 224 : i32
    %117 = tpu.dynamic_rotate %9 by %c224_i32_31 dim 1 : vector<16x256xf32>, i32 -> vector<16x256xf32>
    %118 = arith.mulf %116, %117 : vector<16x256xf32>
    %119 = arith.addf %113, %118 : vector<16x256xf32>
    %120 = arith.truncf %119 : vector<16x256xf32> to vector<16x256xbf16>
    %c0_32 = arith.constant 0 : index
    %c0_33 = arith.constant 0 : index
    %121 = vector.load %arg6[%c0_32, %c0_33] : memref<256x256xbf16, #tpu.memory_space<vmem>>, vector<256x256xbf16>
    %cst_34 = arith.constant dense<0.000000e+00> : vector<16x256xf32>
    %122 = tpu.matmul %120, %121, %cst_34 {dimension_numbers = #tpu.dot_dimension_numbers<[1], [0], [0], [1], [0, 0, 1, 1], [], []>} : vector<16x256xbf16>, vector<256x256xbf16>, vector<16x256xf32> -> vector<16x256xf32>
    %c0_35 = arith.constant 0 : index
    %c0_36 = arith.constant 0 : index
    %123 = vector.load %arg7[%c0_35, %c0_36] : memref<1x256xf32, #tpu.memory_space<vmem>>, vector<1x256xf32>
    %124 = vector.broadcast %123 : vector<1x256xf32> to vector<16x256xf32>
    %125 = arith.addf %122, %124 : vector<16x256xf32>
    %c0_37 = arith.constant 0 : index
    %c0_38 = arith.constant 0 : index
    %126 = vector.load %arg8[%c0_37, %c0_38] : memref<16x256xf32, #tpu.memory_space<vmem>>, vector<16x256xf32>
    tpu.vector_store %arg8[%c0_37, %c0_38], %125 {strides = array<i32>} : memref<16x256xf32, #tpu.memory_space<vmem>>, vector<16x256xf32>,
    return
  }
  func.func @transform_0(%arg0: i32) -> (i32, i32) {
    %c0_i32 = arith.constant 0 : i32
    %c0_i32_0 = arith.constant 0 : i32
    return %arg0, %c0_i32 : i32, i32
  }
  func.func @transform_1(%arg0: i32) -> (i32, i32) {
    %c0_i32 = arith.constant 0 : i32
    %c0_i32_0 = arith.constant 0 : i32
    %c0_i32_1 = arith.constant 0 : i32
    return %c0_i32, %c0_i32_0 : i32, i32
  }
  func.func @transform_2(%arg0: i32) -> (i32, i32) {
    %c0_i32 = arith.constant 0 : i32
    %c0_i32_0 = arith.constant 0 : i32
    %c0_i32_1 = arith.constant 0 : i32
    return %c0_i32, %c0_i32_0 : i32, i32
  }
  func.func @transform_3(%arg0: i32) -> (i32, i32) {
    %c0_i32 = arith.constant 0 : i32
    %c0_i32_0 = arith.constant 0 : i32
    %c0_i32_1 = arith.constant 0 : i32
    return %c0_i32, %c0_i32_0 : i32, i32
  }
  func.func @transform_4(%arg0: i32) -> (i32, i32) {
    %c0_i32 = arith.constant 0 : i32
    %c0_i32_0 = arith.constant 0 : i32
    %c0_i32_1 = arith.constant 0 : i32
    return %c0_i32, %c0_i32_0 : i32, i32
  }
  func.func @transform_5(%arg0: i32) -> (i32, i32) {
    %c0_i32 = arith.constant 0 : i32
    %c0_i32_0 = arith.constant 0 : i32
    %c0_i32_1 = arith.constant 0 : i32
    return %c0_i32, %c0_i32_0 : i32, i32
  }
  func.func @transform_6(%arg0: i32) -> (i32, i32) {
    %c0_i32 = arith.constant 0 : i32
    %c0_i32_0 = arith.constant 0 : i32
    %c0_i32_1 = arith.constant 0 : i32
    return %c0_i32, %c0_i32_0 : i32, i32
  }
  func.func @transform_7(%arg0: i32) -> (i32, i32) {
    %c0_i32 = arith.constant 0 : i32
    %c0_i32_0 = arith.constant 0 : i32
    return %arg0, %c0_i32 : i32, i32
  }
}

</mosaic_0001>

<bundles_post_ra>
// kernel: tpu_custom_call.1
= control target key start
LH: loop header
LB: loop body
LE: loop exit
PB: predicated region body
PF: predicated region fallthrough
CT: control target
= control target key end

     0   :  { %12 = vsyncpa [#allocation3], 0  ;;  %s3621_s0 = inlined_call_operand.vmem [shape: f32[16,256], index: 0, kind: input, shape index: {}]   ;;  %s3622_s1 = inlined_call_operand.hbm [shape: bf16[256,768], index: 1, kind: input, shape index: {}]   ;;  %s3623_s2 = inlined_call_operand.vmem [shape: f32[1,768], index: 2, kind: input, shape index: {}]   ;;  %s3624_s3 = inlined_call_operand.vmem [shape: bf16[256,64], index: 3, kind: input, shape index: {}]   ;;  %s3625_s4 = inlined_call_operand.vmem [shape: bf16[64,256], index: 4, kind: input, shape index: {}]   ;;  %s3626_s5 = inlined_call_operand.hbm [shape: bf16[256,256], index: 5, kind: input, shape index: {}]   ;;  %s3627_s6 = inlined_call_operand.vmem [shape: f32[1,256], index: 6, kind: input, shape index: {}]   ;;  %s3628_s7 = inlined_call_operand.hbm [shape: f32[16,256], index: 7, kind: output, shape index: {}]  }
   0x1   :  { %13 = vsyncpa [#allocation6], 0 }
   0x2   :  { %14 = vsyncpa [#allocation4], 0  ;;  %s2907_s24 = smov [#allocation2]   ;;  %s2835_s28 = scalar_lea.hbm %s3622_s1, 12288 }
   0x3   :  { %s22_s25 = sshll.u32 %s2907_s24, 4  ;;  %p2836_p0 = scmp.ne.s32.totalorder %s3622_s1, %s2835_s28  ;;  %s23_s25 = int_to_ptr.vmem [resolvable:$true] %s22_s25 }
   0x4   :  { %p2839_p1 = scmp.lt.u32.totalorder %s2835_s28, %s3622_s1 }
   0x6   :  { %p2841_p2 = pnand %p2839_p1, %p2836_p0 }
   0x8   :  { %2844 = shalt.err (!%p2841_p2)
}
   0x9   :  { %s2845_s10 = scalar_lea.vmem %s23_s25, 12288  ;;  %p2850_p4 = scmp.lt.s32.totalorder %s23_s25, %s23_s25 }
   0xa   :  { %p2846_p3 = scmp.ne.s32.totalorder %s23_s25, %s2845_s10  ;;  %p2851_p5 = scmp.lt.s32.totalorder %s2845_s10, %s2845_s10 }
   0xc   :  { %p2852_p6 = por %p2851_p5, %p2850_p4 }
   0xe   :  { %p2853_p7 = pnand %p2852_p6, %p2846_p3 }
  0x10   :  { %2856 = shalt.err (!%p2853_p7)
}
  0x11   :  { %s2908_s11 = smov 384   ;;  %s2909_s12 = smov 24  }
  0x12   :  { %28 = dma.hbm_to_vmem [thread:$0]  %s3622_s1, 12288, %s23_s25, [#allocation3], %s2908_s11, %s2908_s11, %s2909_s12  }
  0x13   :  { %s2910_s15 = smov [#allocation5]   ;;  %s2857_s19 = scalar_lea.hbm %s3626_s5, 4096 }
  0x14   :  { %s40_s16 = sshll.u32 %s2910_s15, 4  ;;  %p2858_p8 = scmp.ne.s32.totalorder %s3626_s5, %s2857_s19  ;;  %s41_s16 = int_to_ptr.vmem [resolvable:$true] %s40_s16 }
  0x15   :  { %p2861_p9 = scmp.lt.u32.totalorder %s2857_s19, %s3626_s5 }
  0x17   :  { %p2863_p10 = pnand %p2861_p9, %p2858_p8 }
  0x19   :  { %2866 = shalt.err (!%p2863_p10)
}
  0x1a   :  { %s2867_s24 = scalar_lea.vmem %s41_s16, 4096  ;;  %p2872_p12 = scmp.lt.s32.totalorder %s41_s16, %s41_s16 }
  0x1b   :  { %p2868_p11 = scmp.ne.s32.totalorder %s41_s16, %s2867_s24  ;;  %p2873_p13 = scmp.lt.s32.totalorder %s2867_s24, %s2867_s24 }
  0x1d   :  { %p2874_p0 = por %p2873_p13, %p2872_p12 }
  0x1f   :  { %p2875_p1 = pnand %p2874_p0, %p2868_p11 }
  0x21   :  { %2878 = shalt.err (!%p2875_p1)
}
  0x22   :  { %s2911_s1 = smov 128   ;;  %s2912_s25 = smov 8  }
  0x23   :  { %46 = dma.hbm_to_vmem [thread:$0]  %s3626_s5, 4096, %s41_s16, [#allocation6], %s2911_s1, %s2911_s1, %s2912_s25  }
  0x24   :  { %2901 = dma.done.wait [#allocation3], 12288  }
  0x25   :  { %2902 = vsyncadd [#allocation3], 4294955008 }
  0x26   :  { %2903 = dma.done.wait [#allocation6], 4096  }
  0x27   :  { %2904 = vsyncadd [#allocation6], 4294963200  ;;  %v2579_v0 = vld [vmem:[#allocation2 + $0x4] ss:$24 sps:$4 sm:$0xff]   ;;  %v2583_v2 = vld [vmem:[#allocation2] ss:$24 sps:$4 sm:$0xff]  }
  0x28   :  { %v2581_v1 = vld [vmem:[#allocation2 + $0xc] ss:$24 sps:$4 sm:$0xff]   ;;  %670 = vmatprep.subr.bf16.mxu0 %v2579_v0  ;;  %v2584_v3 = vld [vmem:[#allocation2 + $0x8] ss:$24 sps:$4 sm:$0xff]   ;;  %v2587_v5 = vld [vmem:[#allocation2 + $0x3c] ss:$24 sps:$4 sm:$0xff]  }
  0x29   :  { %713 = vmatprep.subr.bf16.mxu1 %v2581_v1  ;;  %v2585_v4 = vld [vmem:[#allocation2 + $0x34] ss:$24 sps:$4 sm:$0xff]   ;;  %671 = vmatpush1.bf16.msra.mxu0 %v2583_v2  ;;  %v2589_v6 = vld [vmem:[#allocation2 + $0x30] ss:$24 sps:$4 sm:$0xff]   ;;  %v2591_v8 = vld [vmem:[#allocation2 + $0x64] ss:$24 sps:$4 sm:$0xff]  }
  0x2a   :  { %714 = vmatpush1.bf16.msra.mxu1 %v2584_v3  ;;  %672 = vmatprep.subr.bf16.mxu0 %v2585_v4  ;;  %v2590_v7 = vld [vmem:[#allocation2 + $0x38] ss:$24 sps:$4 sm:$0xff]   ;;  %v2593_v9 = vld [vmem:[#allocation2 + $0x6c] ss:$24 sps:$4 sm:$0xff]   ;;  %v2596_v11 = vld [vmem:[#allocation2 + $0x68] ss:$24 sps:$4 sm:$0xff]  }
  0x2b   :  { %715 = vmatprep.subr.bf16.mxu1 %v2587_v5  ;;  %v2595_v10 = vld [vmem:[#allocation2 + $0x60] ss:$24 sps:$4 sm:$0xff]   ;;  %v2597_v12 = vld [vmem:[#allocation2 + $0x94] ss:$24 sps:$4 sm:$0xff]   ;;  %v2601_v14 = vld [vmem:[#allocation2 + $0x90] ss:$24 sps:$4 sm:$0xff]  }
  0x2c   :  { %v2599_v13 = vld [vmem:[#allocation2 + $0x9c] ss:$24 sps:$4 sm:$0xff]   ;;  %v2602_v15 = vld [vmem:[#allocation2 + $0x98] ss:$24 sps:$4 sm:$0xff]   ;;  %v2605_v17 = vld [vmem:[#allocation2 + $0xcc] ss:$24 sps:$4 sm:$0xff]  }
  0x2d   :  { %673 = vmatpush1.bf16.msra.mxu0 %v2589_v6  ;;  %v2603_v16 = vld [vmem:[#allocation2 + $0xc4] ss:$24 sps:$4 sm:$0xff]   ;;  %v2607_v18 = vld [vmem:[#allocation2 + $0xc0] ss:$24 sps:$4 sm:$0xff]   ;;  %v2609_v20 = vld [vmem:[#allocation2 + $0xf4] ss:$24 sps:$4 sm:$0xff]  }
  0x2e   :  { %716 = vmatpush1.bf16.msra.mxu1 %v2590_v7  ;;  %674 = vmatprep.subr.bf16.mxu0 %v2591_v8  ;;  %v2608_v19 = vld [vmem:[#allocation2 + $0xc8] ss:$24 sps:$4 sm:$0xff]   ;;  %v2611_v21 = vld [vmem:[#allocation2 + $0xfc] ss:$24 sps:$4 sm:$0xff]   ;;  %v2614_v23 = vld [vmem:[#allocation2 + $0xf8] ss:$24 sps:$4 sm:$0xff]  }
  0x2f   :  { %717 = vmatprep.subr.bf16.mxu1 %v2593_v9  ;;  %v2613_v22 = vld [vmem:[#allocation2 + $0xf0] ss:$24 sps:$4 sm:$0xff]   ;;  %v2615_v24 = vld [vmem:[#allocation2 + $0x124] ss:$24 sps:$4 sm:$0xff]   ;;  %v2619_v26 = vld [vmem:[#allocation2 + $0x120] ss:$24 sps:$4 sm:$0xff]  }
  0x30   :  { %v2617_v25 = vld [vmem:[#allocation2 + $0x12c] ss:$24 sps:$4 sm:$0xff]   ;;  %v2620_v27 = vld [vmem:[#allocation2 + $0x128] ss:$24 sps:$4 sm:$0xff]   ;;  %v2623_v29 = vld [vmem:[#allocation2 + $0x15c] ss:$24 sps:$4 sm:$0xff]  }
  0x31   :  { %675 = vmatpush1.bf16.msra.mxu0 %v2595_v10  ;;  %v2621_v28 = vld [vmem:[#allocation2 + $0x154] ss:$24 sps:$4 sm:$0xff]   ;;  %v2625_v30 = vld [vmem:[#allocation2 + $0x150] ss:$24 sps:$4 sm:$0xff]   ;;  %v2627_v32 = vld [vmem:[#allocation2 + $0x184] ss:$24 sps:$4 sm:$0xff]  }
  0x32   :  { %718 = vmatpush1.bf16.msra.mxu1 %v2596_v11  ;;  %676 = vmatprep.subr.bf16.mxu0 %v2597_v12  ;;  %v2626_v31 = vld [vmem:[#allocation2 + $0x158] ss:$24 sps:$4 sm:$0xff]   ;;  %v2629_v33 = vld [vmem:[#allocation2 + $0x18c] ss:$24 sps:$4 sm:$0xff]   ;;  %v2632_v35 = vld [vmem:[#allocation2 + $0x188] ss:$24 sps:$4 sm:$0xff]  }
  0x33   :  { %719 = vmatprep.subr.bf16.mxu1 %v2599_v13  ;;  %v2631_v34 = vld [vmem:[#allocation2 + $0x180] ss:$24 sps:$4 sm:$0xff]   ;;  %v2633_v36 = vld [vmem:[#allocation2 + $0x1b4] ss:$24 sps:$4 sm:$0xff]   ;;  %v2637_v38 = vld [vmem:[#allocation2 + $0x1b0] ss:$24 sps:$4 sm:$0xff]  }
  0x34   :  { %v2635_v37 = vld [vmem:[#allocation2 + $0x1bc] ss:$24 sps:$4 sm:$0xff]   ;;  %v2638_v39 = vld [vmem:[#allocation2 + $0x1b8] ss:$24 sps:$4 sm:$0xff]   ;;  %v2641_v41 = vld [vmem:[#allocation2 + $0x1ec] ss:$24 sps:$4 sm:$0xff]  }
  0x35   :  { %677 = vmatpush1.bf16.msra.mxu0 %v2601_v14  ;;  %v2639_v40 = vld [vmem:[#allocation2 + $0x1e4] ss:$24 sps:$4 sm:$0xff]   ;;  %v2643_v42 = vld [vmem:[#allocation2 + $0x1e0] ss:$24 sps:$4 sm:$0xff]   ;;  %v2645_v44 = vld [vmem:[#allocation2 + $0x214] ss:$24 sps:$4 sm:$0xff]  }
  0x36   :  { %720 = vmatpush1.bf16.msra.mxu1 %v2602_v15  ;;  %678 = vmatprep.subr.bf16.mxu0 %v2603_v16  ;;  %v2644_v43 = vld [vmem:[#allocation2 + $0x1e8] ss:$24 sps:$4 sm:$0xff]   ;;  %v2647_v45 = vld [vmem:[#allocation2 + $0x21c] ss:$24 sps:$4 sm:$0xff]   ;;  %v2650_v48 = vld [vmem:[#allocation2 + $0x218] ss:$24 sps:$4 sm:$0xff]  }
  0x37   :  { %721 = vmatprep.subr.bf16.mxu1 %v2605_v17  ;;  %v57_v46 = vld [vmem:[%s3621_s0 + $0x8] sm:$0xff]  ;;  %v59_v49 = vld [vmem:[%s3621_s0 + $0x18] sm:$0xff]  ;;  %v56_v3 = vld [vmem:[%s3621_s0] sm:$0xff]  ;;  %s2914_s18 = smov 64   ;;  %s2915_s19 = smov 96   ;;  %vm1473_vm3 = vcmask 523264  }
  0x38   :  { %v2649_v47 = vld [vmem:[#allocation2 + $0x210] ss:$24 sps:$4 sm:$0xff]   ;;  %v2651_v50 = vld [vmem:[#allocation2 + $0x244] ss:$24 sps:$4 sm:$0xff]   ;;  %v61_v51 = vpack.c.bf16 %v59_v49, %v57_v46  ;;  %v2655_v53 = vld [vmem:[#allocation2 + $0x240] ss:$24 sps:$4 sm:$0xff]  }
  0x39   :  { %679 = vmatpush1.bf16.msra.mxu0 %v2607_v18  ;;  %v2653_v52 = vld [vmem:[#allocation2 + $0x24c] ss:$24 sps:$4 sm:$0xff]   ;;  %v2656_v54 = vld [vmem:[#allocation2 + $0x248] ss:$24 sps:$4 sm:$0xff]   ;;  %v2659_v56 = vld [vmem:[#allocation2 + $0x27c] ss:$24 sps:$4 sm:$0xff]  }
  0x3a   :  { %722 = vmatpush1.bf16.msra.mxu1 %v2608_v19  ;;  %680 = vmatprep.subr.bf16.mxu0 %v2609_v20  ;;  %v2657_v55 = vld [vmem:[#allocation2 + $0x274] ss:$24 sps:$4 sm:$0xff]   ;;  %v2661_v57 = vld [vmem:[#allocation2 + $0x270] ss:$24 sps:$4 sm:$0xff]   ;;  %v2663_v59 = vld [vmem:[#allocation2 + $0x2a4] ss:$24 sps:$4 sm:$0xff]  }
  0x3b   :  { %723 = vmatprep.subr.bf16.mxu1 %v2611_v21  ;;  %702 = vmatprep.mubr.bf16.mxu0 %v61_v51  ;;  %v2662_v58 = vld [vmem:[#allocation2 + $0x278] ss:$24 sps:$4 sm:$0xff]   ;;  %v2665_v60 = vld [vmem:[#allocation2 + $0x2ac] ss:$24 sps:$4 sm:$0xff]   ;;  %v2668_v62 = vld [vmem:[#allocation2 + $0x2a8] ss:$24 sps:$4 sm:$0xff]  }
  0x3c   :  { %745 = vmatprep.mubr.bf16.mxu1 %v61_v51  ;;  %v2667_v61 = vld [vmem:[#allocation2 + $0x2a0] ss:$24 sps:$4 sm:$0xff]   ;;  %v2669_v63 = vld [vmem:[#allocation2 + $0x2d4] ss:$24 sps:$4 sm:$0xff]   ;;  %v2673_v1 = vld [vmem:[#allocation2 + $0x2d0] ss:$24 sps:$4 sm:$0xff]  }
  0x3d   :  { %681 = vmatpush1.bf16.msra.mxu0 %v2613_v22  ;;  %v2671_v0 = vld [vmem:[#allocation2 + $0x2dc] ss:$24 sps:$4 sm:$0xff]   ;;  %v2674_v2 = vld [vmem:[#allocation2 + $0x2d8] ss:$24 sps:$4 sm:$0xff]   ;;  %v3001_v10 = vld [vmem:[%s3624_s3 + $0x40] sm:$0xff]   ;;  %s2917_s12 = smov [#allocation7]  }
  0x3e   :  { %724 = vmatpush1.bf16.msra.mxu1 %v2614_v23  ;;  %682 = vmatprep.subr.bf16.mxu0 %v2615_v24  ;;  %v58_v4 = vld [vmem:[%s3621_s0 + $0x10] sm:$0xff]  ;;  %v2680_v8 = vld [vmem:[#allocation2 + $0x44] ss:$24 sps:$4 sm:$0xff]   ;;  %v2678_v9 = vld [vmem:[#allocation2 + $0x40] ss:$24 sps:$4 sm:$0xff]   ;;  %s2217_s13 = sshll.u32 %s2917_s12, 4  ;;  %s2218_s13 = int_to_ptr.vmem [resolvable:$true] %s2217_s13 }
  0x3f   :  { %725 = vmatprep.subr.bf16.mxu1 %v2617_v25  ;;  %v2677_v5 = vld [vmem:[#allocation2 + $0x14] ss:$24 sps:$4 sm:$0xff]   ;;  %v2996_v6 = vpack.c.bf16 %v58_v4, %v56_v3  ;;  %v2675_v7 = vld [vmem:[#allocation2 + $0x10] ss:$24 sps:$4 sm:$0xff]   ;;  %v3008_v11 = vld [vmem:[%s3624_s3] sm:$0xff]   ;;  %p2884_p3 = scmp.lt.s32.totalorder %s2218_s13, %s2218_s13 }
  0x40   :  { %v3013_v12 = vld [vmem:[%s3624_s3 + $0x48] sm:$0xff]   ;;  %v3026_v15 = vld [vmem:[%s3624_s3 + $0x50] sm:$0xff]   ;;  %v2686_v17 = vld [vmem:[#allocation2 + $0xa4] ss:$24 sps:$4 sm:$0xff]  }
  0x41   :  { %683 = vmatpush1.bf16.msra.mxu0 %v2619_v26  ;;  %v2683_v13 = vld [vmem:[#allocation2 + $0x74] ss:$24 sps:$4 sm:$0xff]   ;;  %v2681_v16 = vld [vmem:[#allocation2 + $0x70] ss:$24 sps:$4 sm:$0xff]   ;;  %v2684_v18 = vld [vmem:[#allocation2 + $0xa0] ss:$24 sps:$4 sm:$0xff]  }
  0x42   :  { %726 = vmatpush1.bf16.msra.mxu1 %v2620_v27  ;;  %684 = vmatprep.subr.bf16.mxu0 %v2621_v28  ;;  %v3020_v14 = vld [vmem:[%s3624_s3 + $0x8] sm:$0xff]   ;;  %v3032_v19 = vld [vmem:[%s3624_s3 + $0x10] sm:$0xff]   ;;  %v3038_v20 = vld [vmem:[%s3624_s3 + $0x58] sm:$0xff]  }
  0x43   :  { %727 = vmatprep.subr.bf16.mxu1 %v2623_v29  ;;  %v2689_v21 = vld [vmem:[#allocation2 + $0xd4] ss:$24 sps:$4 sm:$0xff]   ;;  %v3043_v22 = vld [vmem:[%s3624_s3 + $0x18] sm:$0xff]   ;;  %v3048_v23 = vld [vmem:[%s3624_s3 + $0x60] sm:$0xff]  }
  0x44   :  { %v2687_v24 = vld [vmem:[#allocation2 + $0xd0] ss:$24 sps:$4 sm:$0xff]   ;;  %v2692_v25 = vld [vmem:[#allocation2 + $0x104] ss:$24 sps:$4 sm:$0xff]   ;;  %v2690_v28 = vld [vmem:[#allocation2 + $0x100] ss:$24 sps:$4 sm:$0xff]  }
  0x45   :  { %685 = vmatpush1.bf16.msra.mxu0 %v2625_v30  ;;  %v3055_v26 = vld [vmem:[%s3624_s3 + $0x20] sm:$0xff]   ;;  %v3060_v27 = vld [vmem:[%s3624_s3 + $0x68] sm:$0xff]  }
  0x46   :  { %728 = vmatpush1.bf16.msra.mxu1 %v2626_v31  ;;  %686 = vmatprep.subr.bf16.mxu0 %v2627_v32  ;;  %v2695_v29 = vld [vmem:[#allocation2 + $0x134] ss:$24 sps:$4 sm:$0xff]   ;;  %v2693_v30 = vld [vmem:[#allocation2 + $0x130] ss:$24 sps:$4 sm:$0xff]   ;;  %v2698_v31 = vld [vmem:[#allocation2 + $0x164] ss:$24 sps:$4 sm:$0xff]  }
  0x47   :  { %729 = vmatprep.subr.bf16.mxu1 %v2629_v33  ;;  %v2696_v32 = vld [vmem:[#allocation2 + $0x160] ss:$24 sps:$4 sm:$0xff]   ;;  %v2701_v33 = vld [vmem:[#allocation2 + $0x194] ss:$24 sps:$4 sm:$0xff]   ;;  %v2717_v46 = vld [vmem:[#allocation2 + $0x2b0] ss:$24 sps:$4 sm:$0xff]  }
  0x48   :  { %v3080_v49 = vld [vmem:[%s3624_s3 + $0x28] sm:$0xff]  }
  0x49   :  { %687 = vmatpush1.bf16.msra.mxu0 %v2631_v34  ;;  %v2699_v34 = vld [vmem:[#allocation2 + $0x190] ss:$24 sps:$4 sm:$0xff]  }
  0x4a   :  { %730 = vmatpush1.bf16.msra.mxu1 %v2632_v35  ;;  %688 = vmatprep.subr.bf16.mxu0 %v2633_v36  ;;  %v2704_v35 = vld [vmem:[#allocation2 + $0x1c4] ss:$24 sps:$4 sm:$0xff]   ;;  %v2702_v36 = vld [vmem:[#allocation2 + $0x1c0] ss:$24 sps:$4 sm:$0xff]  }
  0x4b   :  { %731 = vmatprep.subr.bf16.mxu1 %v2635_v37  ;;  %v2707_v37 = vld [vmem:[#allocation2 + $0x1f4] ss:$24 sps:$4 sm:$0xff]  }
  0x4d   :  { %689 = vmatpush1.bf16.msra.mxu0 %v2637_v38  ;;  %v2705_v38 = vld [vmem:[#allocation2 + $0x1f0] ss:$24 sps:$4 sm:$0xff]  }
  0x4e   :  { %732 = vmatpush1.bf16.msra.mxu1 %v2638_v39  ;;  %690 = vmatprep.subr.bf16.mxu0 %v2639_v40  ;;  %v2710_v39 = vld [vmem:[#allocation2 + $0x224] ss:$24 sps:$4 sm:$0xff]   ;;  %v2708_v40 = vld [vmem:[#allocation2 + $0x220] ss:$24 sps:$4 sm:$0xff]  }
  0x4f   :  { %733 = vmatprep.subr.bf16.mxu1 %v2641_v41  ;;  %v2713_v41 = vld [vmem:[#allocation2 + $0x254] ss:$24 sps:$4 sm:$0xff]  }
  0x51   :  { %691 = vmatpush1.bf16.msra.mxu0 %v2643_v42  ;;  %v2711_v42 = vld [vmem:[#allocation2 + $0x250] ss:$24 sps:$4 sm:$0xff]  }
  0x52   :  { %734 = vmatpush1.bf16.msra.mxu1 %v2644_v43  ;;  %692 = vmatprep.subr.bf16.mxu0 %v2645_v44  ;;  %v2716_v43 = vld [vmem:[#allocation2 + $0x284] ss:$24 sps:$4 sm:$0xff]   ;;  %v2714_v44 = vld [vmem:[#allocation2 + $0x280] ss:$24 sps:$4 sm:$0xff]  }
  0x53   :  { %735 = vmatprep.subr.bf16.mxu1 %v2647_v45  ;;  %v2719_v45 = vld [vmem:[#allocation2 + $0x2b4] ss:$24 sps:$4 sm:$0xff]  }
  0x55   :  { %693 = vmatpush1.bf16.msra.mxu0 %v2649_v47  ;;  %v2722_v47 = vld [vmem:[#allocation2 + $0x2e4] ss:$24 sps:$4 sm:$0xff]  }
  0x56   :  { %736 = vmatpush1.bf16.msra.mxu1 %v2650_v48  ;;  %694 = vmatprep.subr.bf16.mxu0 %v2651_v50  ;;  %v2720_v48 = vld [vmem:[#allocation2 + $0x2e0] ss:$24 sps:$4 sm:$0xff]   ;;  %v3087_v50 = vld [vmem:[%s3624_s3 + $0x70] sm:$0xff]  }
  0x57   :  { %737 = vmatprep.subr.bf16.mxu1 %v2653_v52  ;;  %v3101_v52 = vld [vmem:[%s3624_s3 + $0x78] sm:$0xff]  }
  0x59   :  { %695 = vmatpush1.bf16.msra.mxu0 %v2655_v53  ;;  %v3108_v53 = vld [vmem:[%s3624_s3 + $0x38] sm:$0xff]  }
  0x5a   :  { %738 = vmatpush1.bf16.msra.mxu1 %v2656_v54  ;;  %696 = vmatprep.subr.bf16.mxu0 %v2657_v55  ;;  %v160_v54 = vlaneseq }
  0x5b   :  { %739 = vmatprep.subr.bf16.mxu1 %v2659_v56 }
  0x5c   :  { %v3116_v55 = vshrl.u32 %v160_v54, 7 }
  0x5d   :  { %697 = vmatpush1.bf16.msra.mxu0 %v2661_v57 }
  0x5e   :  { %740 = vmatpush1.bf16.msra.mxu1 %v2662_v58  ;;  %698 = vmatprep.subr.bf16.mxu0 %v2663_v59  ;;  %v162_v56 = vsub.s32 0, %v3116_v55  ;;  %v170_v57 = vsub.s32 2, %v3116_v55  ;;  %v3123_v58 = vld [vmem:[%s3623_s2] sm:$0x3f]  ;;  %v166_v59 = vsub.s32 1, %v3116_v55  ;;  %s2913_s2 = smov 32  }
  0x5f   :  { %741 = vmatprep.subr.bf16.mxu1 %v2665_v60  ;;  %v174_v60 = vsub.s32 3, %v3116_v55 }
  0x61   :  { %699 = vmatpush1.bf16.msra.mxu0 %v2667_v61  ;;  %v163_v61 = vrot.slane %v3123_v58, %v162_v56 }
  0x62   :  { %742 = vmatpush1.bf16.msra.mxu1 %v2668_v62  ;;  %700 = vmatprep.subr.bf16.mxu0 %v2669_v63  ;;  %v171_v62 = vrot.slane %v3123_v58, %v170_v57  ;;  %v167_v63 = vrot.slane %v3123_v58, %v166_v59 }
  0x63   :  { %743 = vmatprep.subr.bf16.mxu1 %v2671_v0  ;;  %v175_v0 = vrot.slane %v3123_v58, %v174_v60 }
  0x65   :  { %701 = vmatpush1.bf16.msra.mxu0 %v2673_v1 }
  0x66   :  { %744 = vmatpush1.bf16.msra.mxu1 %v2674_v2  ;;  %756 = vmatprep.subr.bf16.mxu0 %v2677_v5 }
  0x67   :  { %2390 = vmatprep.subr.bf16.mxu1 %v3001_v10 }
  0x68   :  { %703 = vmatmul.mubr.bf16.vlgmr.msra.gmra.mrb[0].mxu0 %v2996_v6 }
  0x69   :  { %746 = vmatmul.mubr.bf16.vlgmr.msra.gmra.mrb[0].mxu1 %v2996_v6  ;;  %757 = vmatpush1.bf16.msra.mxu0 %v2675_v7 }
  0x6a   :  { %788 = vmatprep.mubr.bf16.mxu0 %v61_v51  ;;  %758 = vmatprep.subr.bf16.mxu0 %v2680_v8  ;;  %v3093_v51 = vld [vmem:[%s3624_s3 + $0x30] sm:$0xff]  }
  0x6b   :  { %2391 = vmatpush3.bf16.msra.mxu1 %v3008_v11 }
  0x6c   :  { %2392 = vmatprep.subr.bf16.mxu1 %v3013_v12 }
  0x6d   :  { %759 = vmatpush1.bf16.msra.mxu0 %v2678_v9 }
  0x6e   :  { %760 = vmatprep.subr.bf16.mxu0 %v2683_v13 }
  0x6f   :  { %2393 = vmatpush3.bf16.msra.mxu1 %v3020_v14 }
  0x70   :  { %2394 = vmatprep.subr.bf16.mxu1 %v3026_v15 }
  0x71   :  { %761 = vmatpush1.bf16.msra.mxu0 %v2681_v16 }
  0x72   :  { %762 = vmatprep.subr.bf16.mxu0 %v2686_v17 }
  0x73   :  { %2395 = vmatpush3.bf16.msra.mxu1 %v3032_v19 }
  0x74   :  { %2396 = vmatprep.subr.bf16.mxu1 %v3038_v20 }
  0x75   :  { %763 = vmatpush1.bf16.msra.mxu0 %v2684_v18 }
  0x76   :  { %764 = vmatprep.subr.bf16.mxu0 %v2689_v21 }
  0x77   :  { %2397 = vmatpush3.bf16.msra.mxu1 %v3043_v22 }
  0x78   :  { %2398 = vmatprep.subr.bf16.mxu1 %v3048_v23 }
  0x79   :  { %765 = vmatpush1.bf16.msra.mxu0 %v2687_v24 }
  0x7a   :  { %766 = vmatprep.subr.bf16.mxu0 %v2692_v25 }
  0x7b   :  { %2399 = vmatpush3.bf16.msra.mxu1 %v3055_v26 }
  0x7c   :  { %2400 = vmatprep.subr.bf16.mxu1 %v3060_v27 }
  0x7d   :  { %767 = vmatpush1.bf16.msra.mxu0 %v2690_v28 }
  0x7e   :  { %768 = vmatprep.subr.bf16.mxu0 %v2695_v29 }
  0x7f   :  { %2401 = vmatpush3.bf16.msra.mxu1 %v3080_v49 }
  0x80   :  { %2402 = vmatprep.subr.bf16.mxu1 %v3087_v50 }
  0x81   :  { %769 = vmatpush1.bf16.msra.mxu0 %v2693_v30 }
  0x82   :  { %770 = vmatprep.subr.bf16.mxu0 %v2698_v31 }
  0x83   :  { %2403 = vmatpush3.bf16.msra.mxu1 %v3093_v51 }
  0x84   :  { %2404 = vmatprep.subr.bf16.mxu1 %v3101_v52 }
  0x85   :  { %771 = vmatpush1.bf16.msra.mxu0 %v2696_v32 }
  0x86   :  { %772 = vmatprep.subr.bf16.mxu0 %v2701_v33 }
  0x87   :  { %2405 = vmatpush3.bf16.msra.mxu1 %v3108_v53 }
  0x88   :  { %2412 = vmatprep.subr.bf16.mxu1 %v3001_v10 }
  0x89   :  { %773 = vmatpush1.bf16.msra.mxu0 %v2699_v34 }
  0x8a   :  { %774 = vmatprep.subr.bf16.mxu0 %v2704_v35 }
  0x8d   :  { %775 = vmatpush1.bf16.msra.mxu0 %v2702_v36 }
  0x8e   :  { %776 = vmatprep.subr.bf16.mxu0 %v2707_v37 }
  0x91   :  { %777 = vmatpush1.bf16.msra.mxu0 %v2705_v38 }
  0x92   :  { %778 = vmatprep.subr.bf16.mxu0 %v2710_v39 }
  0x95   :  { %779 = vmatpush1.bf16.msra.mxu0 %v2708_v40  ;;  %v178_v40 = vsub.s32 4, %v3116_v55 }
  0x96   :  { %780 = vmatprep.subr.bf16.mxu0 %v2713_v41 }
  0x99   :  { %781 = vmatpush1.bf16.msra.mxu0 %v2711_v42 }
  0x9a   :  { %782 = vmatprep.subr.bf16.mxu0 %v2716_v43  ;;  %v179_v43 = vrot.slane %v3123_v58, %v178_v40 }
  0x9d   :  { %783 = vmatpush1.bf16.msra.mxu0 %v2714_v44 }
  0x9e   :  { %784 = vmatprep.subr.bf16.mxu0 %v2719_v45 }
  0xa1   :  { %785 = vmatpush1.bf16.msra.mxu0 %v2717_v46 }
  0xa2   :  { %786 = vmatprep.subr.bf16.mxu0 %v2722_v47 }
  0xa5   :  { %787 = vmatpush1.bf16.msra.mxu0 %v2720_v48  ;;  %v182_v48 = vsub.s32 5, %v3116_v55 }
  0xa6   :  { %2478 = vmatprep.subr.bf16.mxu0 %v3001_v10 }
  0xa7   :  { %v183_v57 = vrot.slane %v3123_v58, %v182_v48  ;;  %v3223_v58 = vand.u32 127, %v160_v54 }
  0xa8   :  { %789 = vmatmul.mubr.bf16.vlgmr.msra.gmra.mrb[4].mxu0 %v2996_v6 }
  0xa9   :  { %2479 = vmatpush3.bf16.msra.mxu0 %v3008_v11  ;;  %vm992_vm0 = vcmp.lt.s32.totalorder %v3223_v58, 32  ;;  %vm1052_vm1 = vcmp.lt.s32.totalorder %v3223_v58, 64  ;;  %vm1112_vm2 = vcmp.lt.s32.totalorder %v3223_v58, 96 }
  0xaa   :  { %2480 = vmatprep.subr.bf16.mxu0 %v3013_v12 }
  0xad   :  { %2481 = vmatpush3.bf16.msra.mxu0 %v3020_v14 }
  0xae   :  { %2482 = vmatprep.subr.bf16.mxu0 %v3026_v15 }
  0xb1   :  { %2483 = vmatpush3.bf16.msra.mxu0 %v3032_v19 }
  0xb2   :  { %2484 = vmatprep.subr.bf16.mxu0 %v3038_v20 }
  0xb5   :  { %2485 = vmatpush3.bf16.msra.mxu0 %v3043_v22 }
  0xb6   :  { %2486 = vmatprep.subr.bf16.mxu0 %v3048_v23 }
  0xb9   :  { %2487 = vmatpush3.bf16.msra.mxu0 %v3055_v26 }
  0xba   :  { %2488 = vmatprep.subr.bf16.mxu0 %v3060_v27 }
  0xbd   :  { %2489 = vmatpush3.bf16.msra.mxu0 %v3080_v49 }
  0xbe   :  { %2490 = vmatprep.subr.bf16.mxu0 %v3087_v50 }
  0xc1   :  { %2491 = vmatpush3.bf16.msra.mxu0 %v3093_v51 }
  0xc2   :  { %2492 = vmatprep.subr.bf16.mxu0 %v3101_v52 }
  0xc5   :  { %2493 = vmatpush3.bf16.msra.mxu0 %v3108_v53 }
  0xc6   :  { %2522 = vmatprep.subr.bf16.mxu0 %v3001_v10 }
 0x13b   :  { %v704_v1 = vpop.f32.mrb[0].mxu0 }
 0x13c   :  { %v747_v2 = vpop.f32.mrb[0].mxu1  ;;  %v3135_v3 = vadd.f32 %v704_v1, %v163_v61  ;;  %v706_v5 = vpop.f32.mrb[1].mxu0 }
 0x13d   :  { %v748_v4 = vadd.f32 %v747_v2, %v171_v62  ;;  %v749_v6 = vpop.f32.mrb[1].mxu1  ;;  %v3137_v7 = vadd.f32 %v706_v5, %v167_v63  ;;  %v708_v9 = vpop.f32.mrb[2].mxu0 }
 0x13e   :  { %v750_v8 = vadd.f32 %v749_v6, %v175_v0  ;;  %v751_v13 = vpop.f32.mrb[2].mxu1  ;;  %v3139_v16 = vadd.f32 %v708_v9, %v163_v61  ;;  %v710_v21 = vpop.f32.mrb[3].mxu0 }
 0x13f   :  { %v752_v17 = vadd.f32 %v751_v13, %v171_v62  ;;  %v753_v18 = vpop.f32.mrb[3].mxu1  ;;  %982 = vrot.lane.b32.xlu0 %v748_v4, %s2913_s2  ;;  %v3142_v25 = vadd.f32 %v710_v21, %v167_v63  ;;  %v1165_v29 = vmul.f32 %v748_v4, %v3137_v7  ;;  %v839_v30 = vmul.f32 %v748_v4, %v3135_v3 }
 0x140   :  { %v754_v24 = vadd.f32 %v753_v18, %v175_v0  ;;  %986 = vrot.lane.b32.xlu1 %v750_v8, %s2913_s2  ;;  %v840_v28 = vmul.f32 %v750_v8, %v3137_v7  ;;  %v1164_v34 = vmul.f32 %v750_v8, %v3135_v3 }
 0x141   :  { %v841_v31 = vmul.f32 %v752_v17, %v3139_v16  ;;  %v1167_v33 = vmul.f32 %v752_v17, %v3142_v25 }
 0x142   :  { %v842_v32 = vmul.f32 %v754_v24, %v3142_v25  ;;  %v1166_v35 = vmul.f32 %v754_v24, %v3139_v16 }
 0x143   :  { %984 = vrot.lane.b32.xlu0 %v752_v17, %s2913_s2  ;;  %v843_v36 = vpack.c.bf16 %v841_v31, %v839_v30  ;;  %v1169_v38 = vpack.c.bf16 %v1167_v33, %v1165_v29 }
 0x144   :  { %988 = vrot.lane.b32.xlu1 %v754_v24, %s2913_s2  ;;  %v844_v37 = vpack.c.bf16 %v842_v32, %v840_v28  ;;  %v1168_v39 = vpack.c.bf16 %v1166_v35, %v1164_v34 }
 0x145   :  { %1202 = vmatprep.mubr.bf16.mxu0 %v1169_v38 }
 0x146   :  { %973 = vmatprep.mubr.bf16.mxu1 %v844_v37  ;;  %1203 = vmatmul.mubr.bf16.vlgmr.msra.gmra.mrb[8].mxu0 %v1168_v39 }
 0x147   :  { %1044 = vrot.lane.b32.xlu0 %v748_v4, %s2914_s18  ;;  %974 = vmatmul.mubr.bf16.vlgmr.msra.gmra.mrb[4].mxu1 %v843_v36 }
 0x148   :  { %1046 = vrot.lane.b32.xlu1 %v752_v17, %s2914_s18  ;;  %2413 = vmatpush3.bf16.msra.mxu1 %v3008_v11 }
 0x149   :  { %2523 = vmatpush3.bf16.msra.mxu0 %v3008_v11  ;;  %2414 = vmatprep.subr.bf16.mxu1 %v3013_v12 }
 0x14a   :  { %2524 = vmatprep.subr.bf16.mxu0 %v3013_v12 }
 0x14b   :  { %1048 = vrot.lane.b32.xlu0 %v750_v8, %s2914_s18 }
 0x14c   :  { %1050 = vrot.lane.b32.xlu1 %v754_v24, %s2914_s18  ;;  %2415 = vmatpush3.bf16.msra.mxu1 %v3020_v14 }
 0x14d   :  { %2525 = vmatpush3.bf16.msra.mxu0 %v3020_v14  ;;  %2416 = vmatprep.subr.bf16.mxu1 %v3026_v15 }
 0x14e   :  { %2526 = vmatprep.subr.bf16.mxu0 %v3026_v15 }
 0x14f   :  { %1104 = vrot.lane.b32.xlu0 %v748_v4, %s2915_s19 }
 0x150   :  { %1106 = vrot.lane.b32.xlu1 %v752_v17, %s2915_s19  ;;  %2417 = vmatpush3.bf16.msra.mxu1 %v3032_v19 }
 0x151   :  { %2527 = vmatpush3.bf16.msra.mxu0 %v3032_v19  ;;  %2418 = vmatprep.subr.bf16.mxu1 %v3038_v20 }
 0x152   :  { %2528 = vmatprep.subr.bf16.mxu0 %v3038_v20 }
 0x153   :  { %1108 = vrot.lane.b32.xlu0 %v750_v8, %s2915_s19 }
 0x154   :  { %1110 = vrot.lane.b32.xlu1 %v754_v24, %s2915_s19  ;;  %2419 = vmatpush3.bf16.msra.mxu1 %v3043_v22 }
 0x155   :  { %2529 = vmatpush3.bf16.msra.mxu0 %v3043_v22  ;;  %2420 = vmatprep.subr.bf16.mxu1 %v3048_v23 }
 0x156   :  { %2530 = vmatprep.subr.bf16.mxu0 %v3048_v23 }
 0x158   :  { %2421 = vmatpush3.bf16.msra.mxu1 %v3055_v26 }
 0x159   :  { %2531 = vmatpush3.bf16.msra.mxu0 %v3055_v26  ;;  %2422 = vmatprep.subr.bf16.mxu1 %v3060_v27 }
 0x15a   :  { %2532 = vmatprep.subr.bf16.mxu0 %v3060_v27 }
 0x15c   :  { %2423 = vmatpush3.bf16.msra.mxu1 %v3080_v49 }
 0x15d   :  { %2533 = vmatpush3.bf16.msra.mxu0 %v3080_v49  ;;  %2424 = vmatprep.subr.bf16.mxu1 %v3087_v50 }
 0x15e   :  { %2534 = vmatprep.subr.bf16.mxu0 %v3087_v50 }
 0x160   :  { %2425 = vmatpush3.bf16.msra.mxu1 %v3093_v51 }
 0x161   :  { %2535 = vmatpush3.bf16.msra.mxu0 %v3093_v51  ;;  %2426 = vmatprep.subr.bf16.mxu1 %v3101_v52 }
 0x162   :  { %2536 = vmatprep.subr.bf16.mxu0 %v3101_v52 }
 0x164   :  { %2427 = vmatpush3.bf16.msra.mxu1 %v3108_v53 }
 0x165   :  { %2537 = vmatpush3.bf16.msra.mxu0 %v3108_v53  ;;  %2434 = vmatprep.subr.bf16.mxu1 %v3001_v10 }
 0x17b   :  { %v790_v41 = vpop.f32.mrb[4].mxu0 }
 0x17c   :  { %v792_v42 = vpop.f32.mrb[5].mxu0  ;;  %v3196_v46 = vadd.f32 %v790_v41, %v179_v43 }
 0x17d   :  { %v794_v44 = vpop.f32.mrb[6].mxu0  ;;  %v3210_v60 = vadd.f32 %v792_v42, %v183_v57 }
 0x17e   :  { %v796_v45 = vpop.f32.mrb[7].mxu0  ;;  %v3198_v47 = vadd.f32 %v794_v44, %v179_v43  ;;  %1573 = vrot.lane.b32.xlu0 %v3196_v46, %s2913_s2 }
 0x17f   :  { %v3212_v61 = vadd.f32 %v796_v45, %v183_v57 }
 0x180   :  { %1575 = vrot.lane.b32.xlu1 %v3198_v47, %s2913_s2 }
 0x182   :  { %1642 = vrot.lane.b32.xlu0 %v3196_v46, %s2914_s18 }
 0x184   :  { %1644 = vrot.lane.b32.xlu1 %v3198_v47, %s2914_s18 }
 0x186   :  { %1711 = vrot.lane.b32.xlu0 %v3196_v46, %s2915_s19 }
 0x188   :  { %1713 = vrot.lane.b32.xlu1 %v3198_v47, %s2915_s19 }
 0x18a   :  { %1577 = vrot.lane.b32.xlu0 %v3210_v60, %s2913_s2 }
 0x18c   :  { %1579 = vrot.lane.b32.xlu1 %v3212_v61, %s2913_s2 }
 0x18e   :  { %1646 = vrot.lane.b32.xlu0 %v3210_v60, %s2914_s18 }
 0x190   :  { %1648 = vrot.lane.b32.xlu1 %v3212_v61, %s2914_s18 }
 0x192   :  { %1715 = vrot.lane.b32.xlu0 %v3210_v60, %s2915_s19 }
 0x194   :  { %1717 = vrot.lane.b32.xlu1 %v3212_v61, %s2915_s19 }
 0x1b1   :  { %v983_v62 = vpop.permute.xlu0 %982 }
 0x1b2   :  { %v987_v63 = vpop.permute.xlu1 %986 }
 0x1b3   :  { %v993_v54 = vsel %vm992_vm0, %v983_v62, %v987_v63  ;;  %v995_v0 = vsel %vm992_vm0, %v987_v63, %v983_v62 }
 0x1b4   :  { %v997_v2 = vmul.f32 %v995_v0, %v3135_v3  ;;  %v998_v4 = vmul.f32 %v993_v54, %v3137_v7  ;;  %v3241_v6 = vmul.f32 %v993_v54, %v3135_v3  ;;  %v3244_v8 = vmul.f32 %v995_v0, %v3137_v7 }
 0x1b5   :  { %v985_v1 = vpop.permute.xlu0 %984 }
 0x1b6   :  { %v989_v5 = vpop.permute.xlu1 %988 }
 0x1b7   :  { %v994_v9 = vsel %vm992_vm0, %v985_v1, %v989_v5  ;;  %v996_v13 = vsel %vm992_vm0, %v989_v5, %v985_v1 }
 0x1b8   :  { %v999_v17 = vmul.f32 %v996_v13, %v3139_v16  ;;  %v1000_v18 = vmul.f32 %v994_v9, %v3142_v25  ;;  %v3253_v21 = vmul.f32 %v994_v9, %v3139_v16  ;;  %v3256_v24 = vmul.f32 %v996_v13, %v3142_v25 }
 0x1b9   :  { %v1045_v28 = vpop.permute.xlu0 %1044 }
 0x1ba   :  { %v1001_v29 = vpack.c.bf16 %v999_v17, %v997_v2  ;;  %v1215_v30 = vpack.c.bf16 %v3253_v21, %v3241_v6  ;;  %v1047_v31 = vpop.permute.xlu1 %1046  ;;  %v1002_v32 = vpack.c.bf16 %v1000_v18, %v998_v4  ;;  %v1216_v33 = vpack.c.bf16 %v3256_v24, %v3244_v8 }
 0x1bc   :  { %1035 = vmatprep.mubr.bf16.mxu1 %v1002_v32 }
 0x1bd   :  { %v1049_v34 = vpop.permute.xlu0 %1048  ;;  %1036 = vmatmul.mubr.bf16.vlgmr.msra.gmra.mrb[8].mxu1 %v1001_v29 }
 0x1be   :  { %v1053_v35 = vsel %vm1052_vm1, %v1045_v28, %v1049_v34  ;;  %v1055_v36 = vsel %vm1052_vm1, %v1049_v34, %v1045_v28  ;;  %2435 = vmatpush3.bf16.msra.mxu1 %v3008_v11  ;;  %v1051_v37 = vpop.permute.xlu1 %1050 }
 0x1bf   :  { %v1058_v38 = vmul.f32 %v1053_v35, %v3137_v7  ;;  %v1258_v39 = vmul.f32 %v1053_v35, %v3135_v3  ;;  %v1259_v40 = vmul.f32 %v1055_v36, %v3137_v7  ;;  %2436 = vmatprep.subr.bf16.mxu1 %v3013_v12  ;;  %v1054_v41 = vsel %vm1052_vm1, %v1047_v31, %v1051_v37 }
 0x1c0   :  { %v1056_v42 = vsel %vm1052_vm1, %v1051_v37, %v1047_v31  ;;  %v1060_v43 = vmul.f32 %v1054_v41, %v3142_v25  ;;  %v1260_v44 = vmul.f32 %v1054_v41, %v3139_v16  ;;  %v1057_v17 = vmul.f32 %v1055_v36, %v3135_v3 }
 0x1c1   :  { %v1261_v45 = vmul.f32 %v1056_v42, %v3142_v25  ;;  %v1105_v48 = vpop.permute.xlu0 %1104  ;;  %v1059_v18 = vmul.f32 %v1056_v42, %v3139_v16 }
 0x1c2   :  { %2437 = vmatpush3.bf16.msra.mxu1 %v3020_v14  ;;  %v1107_v57 = vpop.permute.xlu1 %1106  ;;  %v1262_v62 = vpack.c.bf16 %v1260_v44, %v1258_v39  ;;  %v1062_v63 = vpack.c.bf16 %v1060_v43, %v1058_v38 }
 0x1c3   :  { %2438 = vmatprep.subr.bf16.mxu1 %v3026_v15  ;;  %v1263_v54 = vpack.c.bf16 %v1261_v45, %v1259_v40  ;;  %v1061_v31 = vpack.c.bf16 %v1059_v18, %v1057_v17  ;;  %v3452_v17 = vld [vmem:[%s3625_s4 + $0x30] ss:$8 sps:$4 sm:$0xff]  }
 0x1c4   :  { %1095 = vmatprep.mubr.bf16.mxu1 %v1062_v63 }
 0x1c5   :  { %1296 = vmatprep.mubr.bf16.mxu0 %v1263_v54  ;;  %v1109_v0 = vpop.permute.xlu0 %1108  ;;  %v3403_v54 = vld [vmem:[%s3625_s4 + $0x4] ss:$8 sps:$4 sm:$0xff]  }
 0x1c6   :  { %v1113_v1 = vsel %vm1112_vm2, %v1105_v48, %v1109_v0  ;;  %2439 = vmatpush3.bf16.msra.mxu1 %v3032_v19  ;;  %1297 = vmatmul.mubr.bf16.vlgmr.msra.gmra.mrb[12].mxu0 %v1262_v62  ;;  %v1111_v2 = vpop.permute.xlu1 %1110  ;;  %v1115_v34 = vsel %vm1112_vm2, %v1109_v0, %v1105_v48  ;;  %v3408_v0 = vld [vmem:[%s3625_s4] ss:$8 sps:$4 sm:$0xff]  }
 0x1c7   :  { %v3286_v4 = vmul.f32 %v1113_v1, %v3135_v3  ;;  %2440 = vmatprep.subr.bf16.mxu1 %v3038_v20  ;;  %v1114_v5 = vsel %vm1112_vm2, %v1107_v57, %v1111_v2  ;;  %v1118_v28 = vmul.f32 %v1113_v1, %v3137_v7  ;;  %v1116_v35 = vsel %vm1112_vm2, %v1111_v2, %v1107_v57  ;;  %v3413_v1 = vld [vmem:[%s3625_s4 + $0x14] ss:$8 sps:$4 sm:$0xff]   ;;  %v3422_v2 = vld [vmem:[%s3625_s4 + $0x10] ss:$8 sps:$4 sm:$0xff]  }
 0x1c8   :  { %v3292_v9 = vmul.f32 %v1114_v5, %v3139_v16  ;;  %v1120_v29 = vmul.f32 %v1114_v5, %v3142_v25  ;;  %v1117_v36 = vmul.f32 %v1115_v34, %v3135_v3  ;;  %v1119_v37 = vmul.f32 %v1116_v35, %v3139_v16  ;;  %1477 = vmatprep.subr.bf16.mxu0 %v3403_v54 }
 0x1c9   :  { %v1306_v3 = vmul.f32 %v1115_v34, %v3137_v7  ;;  %v1308_v16 = vmul.f32 %v1116_v35, %v3142_v25  ;;  %1478 = vmatpush1.bf16.msra.mxu0 %v3408_v0  ;;  %v2916_v5 = vmov 0  }
 0x1ca   :  { %2441 = vmatpush3.bf16.msra.mxu1 %v3043_v22  ;;  %v1309_v13 = vpack.c.bf16 %v3292_v9, %v3286_v4  ;;  %v1122_v32 = vpack.c.bf16 %v1120_v29, %v1118_v28  ;;  %v1121_v38 = vpack.c.bf16 %v1119_v37, %v1117_v36  ;;  %1479 = vmatprep.subr.bf16.mxu0 %v3413_v1  ;;  %v3429_v4 = vld [vmem:[%s3625_s4 + $0x24] ss:$8 sps:$4 sm:$0xff]   ;;  %v3438_v9 = vld [vmem:[%s3625_s4 + $0x20] ss:$8 sps:$4 sm:$0xff]  }
 0x1cb   :  { %2442 = vmatprep.subr.bf16.mxu1 %v3048_v23  ;;  %v1310_v42 = vpack.c.bf16 %v1308_v16, %v1306_v3  ;;  %1509 = vmatprep.mubr.bf16.mxu0 %v2916_v5 }
 0x1cd   :  { %1480 = vmatpush1.bf16.msra.mxu0 %v3422_v2 }
 0x1ce   :  { %2443 = vmatpush3.bf16.msra.mxu1 %v3055_v26  ;;  %1481 = vmatprep.subr.bf16.mxu0 %v3429_v4 }
 0x1cf   :  { %2444 = vmatprep.subr.bf16.mxu1 %v3060_v27 }
 0x1d1   :  { %1482 = vmatpush1.bf16.msra.mxu0 %v3438_v9 }
 0x1d2   :  { %2445 = vmatpush3.bf16.msra.mxu1 %v3080_v49 }
 0x1d3   :  { %2446 = vmatprep.subr.bf16.mxu1 %v3087_v50 }
 0x1d6   :  { %2447 = vmatpush3.bf16.msra.mxu1 %v3093_v51 }
 0x1d7   :  { %2448 = vmatprep.subr.bf16.mxu1 %v3101_v52 }
 0x1da   :  { %2449 = vmatpush3.bf16.msra.mxu1 %v3108_v53 }
 0x1db   :  { %2456 = vmatprep.subr.bf16.mxu1 %v3001_v10 }
 0x1dd   :  { %1096 = vmatmul.mubr.bf16.vlgmr.msra.gmra.mrb[12].mxu1 %v1061_v31 }
 0x1de   :  { %2457 = vmatpush3.bf16.msra.mxu1 %v3008_v11  ;;  %1155 = vmatprep.mubr.bf16.mxu1 %v1122_v32 }
 0x1df   :  { %2458 = vmatprep.subr.bf16.mxu1 %v3013_v12 }
 0x1e2   :  { %2459 = vmatpush3.bf16.msra.mxu1 %v3020_v14 }
 0x1e3   :  { %2460 = vmatprep.subr.bf16.mxu1 %v3026_v15 }
 0x1e6   :  { %2461 = vmatpush3.bf16.msra.mxu1 %v3032_v19 }
 0x1e7   :  { %2462 = vmatprep.subr.bf16.mxu1 %v3038_v20 }
 0x1ea   :  { %2463 = vmatpush3.bf16.msra.mxu1 %v3043_v22 }
 0x1eb   :  { %2464 = vmatprep.subr.bf16.mxu1 %v3048_v23 }
 0x1ee   :  { %2465 = vmatpush3.bf16.msra.mxu1 %v3055_v26 }
 0x1ef   :  { %2466 = vmatprep.subr.bf16.mxu1 %v3060_v27 }
 0x1f2   :  { %2467 = vmatpush3.bf16.msra.mxu1 %v3080_v49 }
 0x1f3   :  { %2468 = vmatprep.subr.bf16.mxu1 %v3087_v50 }
 0x1f6   :  { %2469 = vmatpush3.bf16.msra.mxu1 %v3093_v51 }
 0x1f7   :  { %2470 = vmatprep.subr.bf16.mxu1 %v3101_v52 }
 0x1fa   :  { %2471 = vmatpush3.bf16.msra.mxu1 %v3108_v53 }
 0x1fb   :  { %2500 = vmatprep.subr.bf16.mxu1 %v3001_v10 }
 0x1fd   :  { %1156 = vmatmul.mubr.bf16.vlgmr.msra.gmra.mrb[16].mxu1 %v1121_v38 }
 0x1fe   :  { %2501 = vmatpush3.bf16.msra.mxu1 %v3008_v11  ;;  %1249 = vmatprep.mubr.bf16.mxu1 %v1216_v33 }
 0x1ff   :  { %2502 = vmatprep.subr.bf16.mxu1 %v3013_v12 }
 0x202   :  { %2503 = vmatpush3.bf16.msra.mxu1 %v3020_v14 }
 0x203   :  { %2504 = vmatprep.subr.bf16.mxu1 %v3026_v15 }
 0x206   :  { %2505 = vmatpush3.bf16.msra.mxu1 %v3032_v19 }
 0x207   :  { %2506 = vmatprep.subr.bf16.mxu1 %v3038_v20 }
 0x20a   :  { %2507 = vmatpush3.bf16.msra.mxu1 %v3043_v22 }
 0x20b   :  { %2508 = vmatprep.subr.bf16.mxu1 %v3048_v23 }
 0x20e   :  { %2509 = vmatpush3.bf16.msra.mxu1 %v3055_v26 }
 0x20f   :  { %2510 = vmatprep.subr.bf16.mxu1 %v3060_v27 }
 0x212   :  { %2511 = vmatpush3.bf16.msra.mxu1 %v3080_v49 }
 0x213   :  { %2512 = vmatprep.subr.bf16.mxu1 %v3087_v50 }
 0x216   :  { %2513 = vmatpush3.bf16.msra.mxu1 %v3093_v51 }
 0x217   :  { %2514 = vmatprep.subr.bf16.mxu1 %v3101_v52 }
 0x219   :  { %v2494_v24 = vpop.f32.mrb[8].mxu0 }
 0x21a   :  { %2515 = vmatpush3.bf16.msra.mxu1 %v3108_v53  ;;  %v2406_v8 = vpop.f32.mrb[4].mxu1  ;;  %v2495_v40 = vpop.f32.mrb[9].mxu0 }
 0x21b   :  { %v2407_v33 = vpop.f32.mrb[5].mxu1  ;;  %2544 = vmatprep.subr.bf16.mxu1 %v3001_v10  ;;  %v3355_v43 = vadd.f32 %v2495_v40, %v2494_v24  ;;  %v2497_v44 = vpop.f32.mrb[10].mxu0 }
 0x21c   :  { %v3353_v39 = vadd.f32 %v2407_v33, %v2406_v8  ;;  %v2409_v41 = vpop.f32.mrb[6].mxu1  ;;  %v2498_v45 = vpop.f32.mrb[11].mxu0 }
 0x21d   :  { %1250 = vmatmul.mubr.bf16.vlgmr.msra.gmra.mrb[20].mxu1 %v1215_v30  ;;  %v2410_v7 = vpop.f32.mrb[7].mxu1  ;;  %v3363_v10 = vadd.f32 %v2498_v45, %v2497_v44 }
 0x21e   :  { %v3360_v25 = vadd.f32 %v2410_v7, %v2409_v41  ;;  %2545 = vmatpush3.bf16.msra.mxu1 %v3008_v11  ;;  %1343 = vmatprep.mubr.bf16.mxu1 %v1310_v42 }
 0x21f   :  { %2546 = vmatprep.subr.bf16.mxu1 %v3013_v12 }
 0x222   :  { %2547 = vmatpush3.bf16.msra.mxu1 %v3020_v14 }
 0x223   :  { %2548 = vmatprep.subr.bf16.mxu1 %v3026_v15 }
 0x226   :  { %2549 = vmatpush3.bf16.msra.mxu1 %v3032_v19 }
 0x227   :  { %2550 = vmatprep.subr.bf16.mxu1 %v3038_v20 }
 0x22a   :  { %2551 = vmatpush3.bf16.msra.mxu1 %v3043_v22 }
 0x22b   :  { %2552 = vmatprep.subr.bf16.mxu1 %v3048_v23 }
 0x22e   :  { %2553 = vmatpush3.bf16.msra.mxu1 %v3055_v26 }
 0x22f   :  { %2554 = vmatprep.subr.bf16.mxu1 %v3060_v27 }
 0x232   :  { %2555 = vmatpush3.bf16.msra.mxu1 %v3080_v49 }
 0x233   :  { %2556 = vmatprep.subr.bf16.mxu1 %v3087_v50 }
 0x236   :  { %2557 = vmatpush3.bf16.msra.mxu1 %v3093_v51 }
 0x237   :  { %2558 = vmatprep.subr.bf16.mxu1 %v3101_v52 }
 0x23a   :  { %2559 = vmatpush3.bf16.msra.mxu1 %v3108_v53 }
 0x23b   :  { %1530 = vmatprep.subr.bf16.mxu1 %v3403_v54 }
 0x23d   :  { %1344 = vmatmul.mubr.bf16.vlgmr.msra.gmra.mrb[24].mxu1 %v1309_v13  ;;  %v3445_v13 = vld [vmem:[%s3625_s4 + $0x34] ss:$8 sps:$4 sm:$0xff]  }
 0x23e   :  { %1531 = vmatpush1.bf16.msra.mxu1 %v3408_v0  ;;  %1562 = vmatprep.mubr.bf16.mxu1 %v2916_v5 }
 0x23f   :  { %1532 = vmatprep.subr.bf16.mxu1 %v3413_v1  ;;  %1483 = vmatprep.subr.bf16.mxu0 %v3445_v13 }
 0x240   :  { %1484 = vmatpush1.bf16.msra.mxu0 %v3452_v17 }
 0x241   :  { %1599 = vmatprep.subr.bf16.mxu0 %v3403_v54 }
 0x242   :  { %1533 = vmatpush1.bf16.msra.mxu1 %v3422_v2 }
 0x243   :  { %1534 = vmatprep.subr.bf16.mxu1 %v3429_v4 }
 0x246   :  { %1535 = vmatpush1.bf16.msra.mxu1 %v3438_v9 }
 0x247   :  { %1536 = vmatprep.subr.bf16.mxu1 %v3445_v13 }
 0x24a   :  { %1537 = vmatpush1.bf16.msra.mxu1 %v3452_v17 }
 0x24b   :  { %1668 = vmatprep.subr.bf16.mxu1 %v3403_v54 }
 0x290   :  { %v2428_v11 = vpop.f32.mrb[8].mxu1 }
 0x291   :  { %v2429_v12 = vpop.f32.mrb[9].mxu1 }
 0x292   :  { %v3382_v14 = vadd.f32 %v2429_v12, %v2428_v11  ;;  %v2431_v15 = vpop.f32.mrb[10].mxu1 }
 0x293   :  { %v2432_v19 = vpop.f32.mrb[11].mxu1 }
 0x294   :  { %v1352_v20 = vmax.f32 %v3353_v39, %v3382_v14  ;;  %v3386_v22 = vadd.f32 %v2432_v19, %v2431_v15 }
 0x296   :  { %v1353_v23 = vmax.f32 %v3360_v25, %v3386_v22 }
 0x299   :  { %v2538_v26 = vpop.f32.mrb[12].mxu0 }
 0x29a   :  { %v2539_v27 = vpop.f32.mrb[13].mxu0 }
 0x29b   :  { %v3390_v49 = vadd.f32 %v2539_v27, %v2538_v26  ;;  %v2541_v50 = vpop.f32.mrb[14].mxu0 }
 0x29c   :  { %v2542_v51 = vpop.f32.mrb[15].mxu0 }
 0x29d   :  { %v3392_v52 = vadd.f32 %v2542_v51, %v2541_v50 }
 0x2b0   :  { %v2450_v53 = vpop.f32.mrb[12].mxu1 }
 0x2b1   :  { %v2451_v6 = vpop.f32.mrb[13].mxu1 }
 0x2b2   :  { %v3394_v21 = vadd.f32 %v2451_v6, %v2450_v53  ;;  %v2453_v30 = vpop.f32.mrb[14].mxu1 }
 0x2b3   :  { %v2454_v48 = vpop.f32.mrb[15].mxu1 }
 0x2b4   :  { %v1354_v57 = vmax.f32 %v1352_v20, %v3394_v21  ;;  %v3397_v62 = vadd.f32 %v2454_v48, %v2453_v30 }
 0x2b6   :  { %v1355_v63 = vmax.f32 %v1353_v23, %v3397_v62 }
 0x2d0   :  { %v2472_v18 = vpop.f32.mrb[16].mxu1 }
 0x2d1   :  { %v2473_v28 = vpop.f32.mrb[17].mxu1 }
 0x2d2   :  { %v2474_v29 = vadd.f32 %v2473_v28, %v2472_v18  ;;  %v2475_v31 = vpop.f32.mrb[18].mxu1 }
 0x2d3   :  { %v2476_v32 = vpop.f32.mrb[19].mxu1 }
 0x2d4   :  { %v1356_v34 = vmax.f32 %v1354_v57, %v2474_v29  ;;  %v2477_v35 = vadd.f32 %v2476_v32, %v2475_v31 }
 0x2d6   :  { %v1357_v36 = vmax.f32 %v1355_v63, %v2477_v35  ;;  %v1358_v37 = vmax.f32 %v1356_v34, %v3355_v43 }
 0x2d8   :  { %v1359_v38 = vmax.f32 %v1357_v36, %v3363_v10 }
 0x2f0   :  { %v2516_v3 = vpop.f32.mrb[20].mxu1 }
 0x2f1   :  { %v2517_v16 = vpop.f32.mrb[21].mxu1 }
 0x2f2   :  { %v2518_v8 = vadd.f32 %v2517_v16, %v2516_v3  ;;  %v2519_v24 = vpop.f32.mrb[22].mxu1 }
 0x2f3   :  { %v2520_v33 = vpop.f32.mrb[23].mxu1 }
 0x2f4   :  { %v1360_v40 = vmax.f32 %v1358_v37, %v2518_v8  ;;  %v2521_v41 = vadd.f32 %v2520_v33, %v2519_v24 }
 0x2f6   :  { %v1361_v42 = vmax.f32 %v1359_v38, %v2521_v41  ;;  %v1362_v44 = vmax.f32 %v1360_v40, %v3390_v49 }
 0x2f8   :  { %v1363_v7 = vmax.f32 %v1361_v42, %v3392_v52 }
 0x310   :  { %v2560_v45 = vpop.f32.mrb[24].mxu1 }
 0x311   :  { %v2561_v11 = vpop.f32.mrb[25].mxu1 }
 0x312   :  { %v2562_v12 = vadd.f32 %v2561_v11, %v2560_v45  ;;  %v2563_v15 = vpop.f32.mrb[26].mxu1 }
 0x313   :  { %v2564_v19 = vpop.f32.mrb[27].mxu1 }
 0x314   :  { %v1364_v20 = vmax.f32 %v1362_v44, %v2562_v12  ;;  %v2565_v23 = vadd.f32 %v2564_v19, %v2563_v15 }
 0x316   :  { %v1366_v26 = vsub.f32 %v3353_v39, %v1364_v20  ;;  %v1372_v27 = vsub.f32 %v3382_v14, %v1364_v20  ;;  %v1378_v50 = vsub.f32 %v3394_v21, %v1364_v20  ;;  %v1384_v51 = vsub.f32 %v2474_v29, %v1364_v20 }
 0x317   :  { %v1390_v53 = vsub.f32 %v3355_v43, %v1364_v20  ;;  %v1396_v6 = vsub.f32 %v2518_v8, %v1364_v20  ;;  %v1402_v30 = vsub.f32 %v3390_v49, %v1364_v20  ;;  %v1408_v48 = vsub.f32 %v2562_v12, %v1364_v20 }
 0x318   :  { %v1368_v57 = vmul.f32 1.442695, %v1366_v26  ;;  %v1374_v63 = vmul.f32 1.442695, %v1372_v27  ;;  %v1365_v18 = vmax.f32 %v1363_v7, %v2565_v23  ;;  %v1380_v28 = vmul.f32 1.442695, %v1378_v50 }
 0x319   :  { %v1386_v31 = vmul.f32 1.442695, %v1384_v51  ;;  %v1392_v29 = vmul.f32 1.442695, %v1390_v53  ;;  %v1398_v49 = vmul.f32 1.442695, %v1396_v6 }
 0x31a   :  { %2799 = vpow2.f32 %v1368_v57  ;;  %v1367_v32 = vsub.f32 %v3360_v25, %v1365_v18  ;;  %v1373_v39 = vsub.f32 %v3386_v22, %v1365_v18  ;;  %v1379_v14 = vsub.f32 %v3397_v62, %v1365_v18 }
 0x31b   :  { %2801 = vpow2.f32 %v1374_v63  ;;  %v1385_v21 = vsub.f32 %v2477_v35, %v1365_v18  ;;  %v1391_v43 = vsub.f32 %v3363_v10, %v1365_v18  ;;  %v1397_v34 = vsub.f32 %v2521_v41, %v1365_v18 }
 0x31c   :  { %2803 = vpow2.f32 %v1380_v28  ;;  %v1370_v36 = vmul.f32 1.442695, %v1367_v32  ;;  %v1403_v37 = vsub.f32 %v3392_v52, %v1365_v18  ;;  %v1376_v38 = vmul.f32 1.442695, %v1373_v39 }
 0x31d   :  { %2805 = vpow2.f32 %v1386_v31  ;;  %v1409_v3 = vsub.f32 %v2565_v23, %v1365_v18  ;;  %v1404_v25 = vmul.f32 1.442695, %v1402_v30  ;;  %v1382_v16 = vmul.f32 1.442695, %v1379_v14 }
 0x31e   :  { %2807 = vpow2.f32 %v1392_v29  ;;  %v1410_v22 = vmul.f32 1.442695, %v1408_v48  ;;  %v1388_v62 = vmul.f32 1.442695, %v1385_v21  ;;  %v1394_v8 = vmul.f32 1.442695, %v1391_v43 }
 0x31f   :  { %2809 = vpow2.f32 %v1398_v49  ;;  %v1400_v52 = vmul.f32 1.442695, %v1397_v34  ;;  %v1406_v42 = vmul.f32 1.442695, %v1403_v37  ;;  %v1412_v11 = vmul.f32 1.442695, %v1409_v3 }
 0x320   :  { %2811 = vpow2.f32 %v1370_v36 }
 0x321   :  { %2813 = vpow2.f32 %v1376_v38 }
 0x322   :  { %2815 = vpow2.f32 %v1404_v25 }
 0x323   :  { %2817 = vpow2.f32 %v1382_v16 }
 0x324   :  { %v2800_v35 = vpop.eup %2799  ;;  %2819 = vpow2.f32 %v1410_v22 }
 0x325   :  { %v2802_v10 = vpop.eup %2801  ;;  %2821 = vpow2.f32 %v1388_v62 }
 0x326   :  { %v1414_v24 = vadd.f32 %v2802_v10, %v2800_v35  ;;  %v2804_v33 = vpop.eup %2803  ;;  %2823 = vpow2.f32 %v1394_v8 }
 0x327   :  { %v2806_v41 = vpop.eup %2805  ;;  %2825 = vpow2.f32 %v1400_v52 }
 0x328   :  { %v1416_v40 = vadd.f32 %v2804_v33, %v1414_v24  ;;  %v2808_v44 = vpop.eup %2807  ;;  %2827 = vpow2.f32 %v1406_v42 }
 0x329   :  { %v2810_v45 = vpop.eup %2809  ;;  %2829 = vpow2.f32 %v1412_v11 }
 0x32a   :  { %v1418_v7 = vadd.f32 %v2806_v41, %v1416_v40  ;;  %v2812_v12 = vpop.eup %2811 }
 0x32b   :  { %v2814_v19 = vpop.eup %2813 }
 0x32c   :  { %v1420_v15 = vadd.f32 %v2808_v44, %v1418_v7  ;;  %v2816_v20 = vpop.eup %2815  ;;  %v1415_v26 = vadd.f32 %v2814_v19, %v2812_v12 }
 0x32d   :  { %v2818_v27 = vpop.eup %2817 }
 0x32e   :  { %v1422_v23 = vadd.f32 %v2810_v45, %v1420_v15  ;;  %v2820_v50 = vpop.eup %2819  ;;  %v1417_v53 = vadd.f32 %v2818_v27, %v1415_v26  ;;  %v2768_v15 = vld [vmem:[#allocation5 + $0x54] ss:$8 sps:$4 sm:$0xff]  }
 0x32f   :  { %v2822_v6 = vpop.eup %2821  ;;  %v2774_v26 = vld [vmem:[#allocation5 + $0x74] ss:$8 sps:$4 sm:$0xff]  }
 0x330   :  { %v1424_v51 = vadd.f32 %v2816_v20, %v1422_v23  ;;  %v1419_v48 = vadd.f32 %v2822_v6, %v1417_v53  ;;  %v2824_v57 = vpop.eup %2823  ;;  %v2771_v23 = vld [vmem:[#allocation5 + $0x64] ss:$8 sps:$4 sm:$0xff]   ;;  %v2780_v53 = vld [vmem:[#allocation5 + $0x94] ss:$8 sps:$4 sm:$0xff]  }
 0x331   :  { %v2826_v18 = vpop.eup %2825 }
 0x332   :  { %v1426_v30 = vadd.f32 %v2820_v50, %v1424_v51  ;;  %v1421_v63 = vadd.f32 %v2824_v57, %v1419_v48  ;;  %v2828_v31 = vpop.eup %2827  ;;  %v2775_v51 = vld [vmem:[#allocation5 + $0x80] ss:$8 sps:$4 sm:$0xff]   ;;  %v2783_v48 = vld [vmem:[#allocation5 + $0xa4] ss:$8 sps:$4 sm:$0xff]  }
 0x333   :  { %v2830_v39 = vpop.eup %2829 }
 0x334   :  { %2831 = vrcp.f32 %v1426_v30  ;;  %v1423_v28 = vadd.f32 %v2826_v18, %v1421_v63  ;;  %v2781_v30 = vld [vmem:[#allocation5 + $0xa0] ss:$8 sps:$4 sm:$0xff]   ;;  %v2784_v63 = vld [vmem:[#allocation5 + $0xb0] ss:$8 sps:$4 sm:$0xff]  }
 0x336   :  { %v1425_v32 = vadd.f32 %v2828_v31, %v1423_v28  ;;  %v2787_v28 = vld [vmem:[#allocation5 + $0xc0] ss:$8 sps:$4 sm:$0xff]  }
 0x338   :  { %v1427_v14 = vadd.f32 %v2830_v39, %v1425_v32  ;;  %v2790_v32 = vld [vmem:[#allocation5 + $0xd0] ss:$8 sps:$4 sm:$0xff]  }
 0x33a   :  { %2833 = vrcp.f32 %v1427_v14  ;;  %v2793_v14 = vld [vmem:[#allocation5 + $0xe0] ss:$8 sps:$4 sm:$0xff]  }
 0x33e   :  { %v2832_v21 = vpop.eup %2831 }
 0x33f   :  { %v1430_v29 = vmul.f32 %v2832_v21, %v2800_v35  ;;  %v1524_v43 = vmul.f32 %v2832_v21, %v2802_v10  ;;  %v1593_v34 = vmul.f32 %v2832_v21, %v2804_v33  ;;  %v1662_v49 = vmul.f32 %v2832_v21, %v2806_v41 }
 0x340   :  { %v3474_v36 = vmul.f32 %v2832_v21, %v2808_v44  ;;  %v3476_v37 = vmul.f32 %v2832_v21, %v2810_v45  ;;  %v3478_v38 = vmul.f32 %v2832_v21, %v2816_v20  ;;  %v3480_v3 = vmul.f32 %v2832_v21, %v2820_v50  ;;  %v2769_v20 = vld [vmem:[#allocation5 + $0x60] ss:$8 sps:$4 sm:$0xff]   ;;  %v2777_v50 = vld [vmem:[#allocation5 + $0x84] ss:$8 sps:$4 sm:$0xff]   ;;  %v2798_v21 = vld [vmem:[#allocation5 + $0xf4] ss:$8 sps:$4 sm:$0xff]  }
 0x344   :  { %v2834_v25 = vpop.eup %2833 }
 0x345   :  { %v1431_v16 = vmul.f32 %v2834_v25, %v2812_v12  ;;  %v1525_v22 = vmul.f32 %v2834_v25, %v2814_v19  ;;  %v1594_v62 = vmul.f32 %v2834_v25, %v2818_v27  ;;  %v1663_v8 = vmul.f32 %v2834_v25, %v2822_v6  ;;  %v2763_v12 = vld [vmem:[#allocation5 + $0x40] ss:$8 sps:$4 sm:$0xff]   ;;  %v2766_v19 = vld [vmem:[#allocation5 + $0x50] ss:$8 sps:$4 sm:$0xff]  }
 0x346   :  { %v1732_v24 = vmul.f32 %v2834_v25, %v2824_v57  ;;  %v1789_v52 = vmul.f32 %v2834_v25, %v2826_v18  ;;  %v3482_v35 = vmul.f32 %v2834_v25, %v2828_v31  ;;  %v3484_v10 = vmul.f32 %v2834_v25, %v2830_v39  ;;  %v2772_v27 = vld [vmem:[#allocation5 + $0x70] ss:$8 sps:$4 sm:$0xff]   ;;  %v2786_v57 = vld [vmem:[#allocation5 + $0xb4] ss:$8 sps:$4 sm:$0xff]   ;;  %v2789_v18 = vld [vmem:[#allocation5 + $0xc4] ss:$8 sps:$4 sm:$0xff]  }
 0x347   :  { %v1432_v33 = vpack.c.bf16 %v1431_v16, %v1430_v29  ;;  %v1526_v40 = vpack.c.bf16 %v1525_v22, %v1524_v43  ;;  %v1595_v41 = vpack.c.bf16 %v1594_v62, %v1593_v34  ;;  %v1664_v42 = vpack.c.bf16 %v1663_v8, %v1662_v49  ;;  %v2778_v6 = vld [vmem:[#allocation5 + $0x90] ss:$8 sps:$4 sm:$0xff]   ;;  %v2792_v31 = vld [vmem:[#allocation5 + $0xd4] ss:$8 sps:$4 sm:$0xff]   ;;  %v2795_v39 = vld [vmem:[#allocation5 + $0xe4] ss:$8 sps:$4 sm:$0xff]   ;;  %v1576_v43 = vpop.permute.xlu1 %1575  ;;  %v1574_v34 = vpop.permute.xlu0 %1573 }
 0x348   :  { %v1733_v44 = vpack.c.bf16 %v1732_v24, %v3474_v36  ;;  %v1790_v7 = vpack.c.bf16 %v1789_v52, %v3476_v37  ;;  %v1847_v45 = vpack.c.bf16 %v3482_v35, %v3478_v38  ;;  %v1904_v11 = vpack.c.bf16 %v3484_v10, %v3480_v3  ;;  %v2796_v29 = vld [vmem:[#allocation5 + $0xf0] ss:$8 sps:$4 sm:$0xff]  }
 0x349   :  { %2350 = vmatmul.mubr.msk.bf16.vlgmr.msra.gmra.mrb[16].mxu0 %vm1473_vm3, %v1432_v33  ;;  %2351 = vmatmul.mubr.msk.bf16.vlgmr.msra.gmra.mrb[28].mxu1 %vm1473_vm3, %v1526_v40 }
 0x34a   :  { %1600 = vmatpush1.bf16.msra.mxu0 %v3408_v0  ;;  %1669 = vmatpush1.bf16.msra.mxu1 %v3408_v0 }
 0x34b   :  { %1601 = vmatprep.subr.bf16.mxu0 %v3413_v1  ;;  %1670 = vmatprep.subr.bf16.mxu1 %v3413_v1  ;;  %v1645_v49 = vpop.permute.xlu1 %1644  ;;  %v1643_v36 = vpop.permute.xlu0 %1642 }
 0x34c   :  { %1631 = vmatprep.mubr.bf16.mxu0 %v2916_v5  ;;  %1700 = vmatprep.mubr.bf16.mxu1 %v2916_v5 }
 0x34e   :  { %1602 = vmatpush1.bf16.msra.mxu0 %v3422_v2  ;;  %1671 = vmatpush1.bf16.msra.mxu1 %v3422_v2 }
 0x34f   :  { %1603 = vmatprep.subr.bf16.mxu0 %v3429_v4  ;;  %1672 = vmatprep.subr.bf16.mxu1 %v3429_v4  ;;  %v1714_v37 = vpop.permute.xlu1 %1713  ;;  %v1712_v38 = vpop.permute.xlu0 %1711 }
 0x352   :  { %1604 = vmatpush1.bf16.msra.mxu0 %v3438_v9  ;;  %1673 = vmatpush1.bf16.msra.mxu1 %v3438_v9 }
 0x353   :  { %1605 = vmatprep.subr.bf16.mxu0 %v3445_v13  ;;  %1674 = vmatprep.subr.bf16.mxu1 %v3445_v13  ;;  %v1580_v3 = vpop.permute.xlu1 %1579  ;;  %v1578_v25 = vpop.permute.xlu0 %1577 }
 0x354   :  { %v3560_v62 = vsel %vm992_vm0, %v1578_v25, %v1574_v34  ;;  %v1581_v10 = vsel %vm992_vm0, %v1574_v34, %v1578_v25 }
 0x356   :  { %1606 = vmatpush1.bf16.msra.mxu0 %v3452_v17  ;;  %1675 = vmatpush1.bf16.msra.mxu1 %v3452_v17 }
 0x357   :  { %1737 = vmatprep.subr.bf16.mxu0 %v3403_v54  ;;  %1794 = vmatprep.subr.bf16.mxu1 %v3403_v54 }
 0x359   :  { %2352 = vmatmul.mubr.msk.bf16.vlgmr.msra.gmra.mrb[20].mxu0 %vm1473_vm3, %v1595_v41  ;;  %2353 = vmatmul.mubr.msk.bf16.vlgmr.msra.gmra.mrb[32].mxu1 %vm1473_vm3, %v1664_v42 }
 0x35a   :  { %1738 = vmatpush1.bf16.msra.mxu0 %v3408_v0  ;;  %1795 = vmatpush1.bf16.msra.mxu1 %v3408_v0 }
 0x35b   :  { %1739 = vmatprep.subr.bf16.mxu0 %v3413_v1  ;;  %1796 = vmatprep.subr.bf16.mxu1 %v3413_v1 }
 0x35c   :  { %1769 = vmatprep.mubr.bf16.mxu0 %v2916_v5  ;;  %1826 = vmatprep.mubr.bf16.mxu1 %v2916_v5 }
 0x35e   :  { %1740 = vmatpush1.bf16.msra.mxu0 %v3422_v2  ;;  %1797 = vmatpush1.bf16.msra.mxu1 %v3422_v2 }
 0x35f   :  { %1741 = vmatprep.subr.bf16.mxu0 %v3429_v4  ;;  %1798 = vmatprep.subr.bf16.mxu1 %v3429_v4 }
 0x362   :  { %1742 = vmatpush1.bf16.msra.mxu0 %v3438_v9  ;;  %1799 = vmatpush1.bf16.msra.mxu1 %v3438_v9 }
 0x363   :  { %1743 = vmatprep.subr.bf16.mxu0 %v3445_v13  ;;  %1800 = vmatprep.subr.bf16.mxu1 %v3445_v13 }
 0x366   :  { %1744 = vmatpush1.bf16.msra.mxu0 %v3452_v17  ;;  %1801 = vmatpush1.bf16.msra.mxu1 %v3452_v17 }
 0x367   :  { %1851 = vmatprep.subr.bf16.mxu0 %v3403_v54  ;;  %1908 = vmatprep.subr.bf16.mxu1 %v3403_v54  ;;  %v2753_v54 = vld [vmem:[#allocation5 + $0x4] ss:$8 sps:$4 sm:$0xff]  }
 0x369   :  { %2354 = vmatmul.mubr.msk.bf16.vlgmr.msra.gmra.mrb[24].mxu0 %vm1473_vm3, %v1733_v44  ;;  %2355 = vmatmul.mubr.msk.bf16.vlgmr.msra.gmra.mrb[36].mxu1 %vm1473_vm3, %v1790_v7  ;;  %v3569_v44 = vsel %vm992_vm0, %v1580_v3, %v1576_v43 }
 0x36a   :  { %1852 = vmatpush1.bf16.msra.mxu0 %v3408_v0  ;;  %1909 = vmatpush1.bf16.msra.mxu1 %v3408_v0  ;;  %v2751_v0 = vld [vmem:[#allocation5] ss:$8 sps:$4 sm:$0xff]  }
 0x36b   :  { %1853 = vmatprep.subr.bf16.mxu0 %v3413_v1  ;;  %1910 = vmatprep.subr.bf16.mxu1 %v3413_v1  ;;  %v2754_v1 = vld [vmem:[#allocation5 + $0x10] ss:$8 sps:$4 sm:$0xff]  }
 0x36c   :  { %1883 = vmatprep.mubr.bf16.mxu0 %v2916_v5  ;;  %1940 = vmatprep.mubr.bf16.mxu1 %v2916_v5  ;;  %v2759_v5 = vld [vmem:[#allocation5 + $0x24] ss:$8 sps:$4 sm:$0xff]  }
 0x36e   :  { %1854 = vmatpush1.bf16.msra.mxu0 %v3422_v2  ;;  %1911 = vmatpush1.bf16.msra.mxu1 %v3422_v2  ;;  %v2756_v2 = vld [vmem:[#allocation5 + $0x14] ss:$8 sps:$4 sm:$0xff]  }
 0x36f   :  { %1855 = vmatprep.subr.bf16.mxu0 %v3429_v4  ;;  %1912 = vmatprep.subr.bf16.mxu1 %v3429_v4  ;;  %v2757_v4 = vld [vmem:[#allocation5 + $0x20] ss:$8 sps:$4 sm:$0xff]  }
 0x372   :  { %1856 = vmatpush1.bf16.msra.mxu0 %v3438_v9  ;;  %1913 = vmatpush1.bf16.msra.mxu1 %v3438_v9  ;;  %v2762_v9 = vld [vmem:[#allocation5 + $0x34] ss:$8 sps:$4 sm:$0xff]  }
 0x373   :  { %1857 = vmatprep.subr.bf16.mxu0 %v3445_v13  ;;  %1914 = vmatprep.subr.bf16.mxu1 %v3445_v13  ;;  %v2760_v13 = vld [vmem:[#allocation5 + $0x30] ss:$8 sps:$4 sm:$0xff]  }
 0x376   :  { %1858 = vmatpush1.bf16.msra.mxu0 %v3452_v17  ;;  %1915 = vmatpush1.bf16.msra.mxu1 %v3452_v17  ;;  %v2765_v17 = vld [vmem:[#allocation5 + $0x44] ss:$8 sps:$4 sm:$0xff]  }
 0x377   :  { %2165 = vmatprep.subr.bf16.mxu0 %v2753_v54 }
 0x379   :  { %2356 = vmatmul.mubr.msk.bf16.vlgmr.msra.gmra.mrb[28].mxu0 %vm1473_vm3, %v1847_v45  ;;  %2357 = vmatmul.mubr.msk.bf16.vlgmr.msra.gmra.mrb[40].mxu1 %vm1473_vm3, %v1904_v11 }
 0x37a   :  { %2166 = vmatpush1.bf16.msra.mxu0 %v2751_v0 }
 0x37b   :  { %2167 = vmatprep.subr.bf16.mxu0 %v2756_v2 }
 0x37e   :  { %2168 = vmatpush1.bf16.msra.mxu0 %v2754_v1  ;;  %v1582_v1 = vsel %vm992_vm0, %v1576_v43, %v1580_v3 }
 0x37f   :  { %2169 = vmatprep.subr.bf16.mxu0 %v2759_v5 }
 0x382   :  { %2170 = vmatpush1.bf16.msra.mxu0 %v2757_v4 }
 0x383   :  { %2171 = vmatprep.subr.bf16.mxu0 %v2762_v9 }
 0x386   :  { %2172 = vmatpush1.bf16.msra.mxu0 %v2760_v13 }
 0x387   :  { %2173 = vmatprep.subr.bf16.mxu0 %v2765_v17  ;;  %v1649_v17 = vpop.permute.xlu1 %1648 }
 0x38a   :  { %2174 = vmatpush1.bf16.msra.mxu0 %v2763_v12  ;;  %v1647_v12 = vpop.permute.xlu0 %1646 }
 0x38b   :  { %2175 = vmatprep.subr.bf16.mxu0 %v2768_v15  ;;  %v1718_v15 = vpop.permute.xlu1 %1717 }
 0x38c   :  { %v1722_v34 = vsel %vm1112_vm2, %v1718_v15, %v1714_v37 }
 0x38e   :  { %2176 = vmatpush1.bf16.msra.mxu0 %v2766_v19  ;;  %v1716_v19 = vpop.permute.xlu0 %1715 }
 0x38f   :  { %2177 = vmatprep.subr.bf16.mxu0 %v2771_v23  ;;  %v1652_v23 = vsel %vm1052_vm1, %v1647_v12, %v1643_v36 }
 0x392   :  { %2178 = vmatpush1.bf16.msra.mxu0 %v2769_v20 }
 0x393   :  { %2179 = vmatprep.subr.bf16.mxu0 %v2774_v26 }
 0x396   :  { %2180 = vmatpush1.bf16.msra.mxu0 %v2772_v27 }
 0x397   :  { %2181 = vmatprep.subr.bf16.mxu0 %v2777_v50 }
 0x39a   :  { %2182 = vmatpush1.bf16.msra.mxu0 %v2775_v51  ;;  %v1650_v51 = vsel %vm1052_vm1, %v1643_v36, %v1647_v12 }
 0x39b   :  { %2183 = vmatprep.subr.bf16.mxu0 %v2780_v53 }
 0x39e   :  { %2184 = vmatpush1.bf16.msra.mxu0 %v2778_v6  ;;  %v3582_v6 = vsel %vm1112_vm2, %v1716_v19, %v1712_v38 }
 0x39f   :  { %2185 = vmatprep.subr.bf16.mxu0 %v2783_v48  ;;  %v1719_v48 = vsel %vm1112_vm2, %v1712_v38, %v1716_v19 }
 0x3a2   :  { %2186 = vmatpush1.bf16.msra.mxu0 %v2781_v30 }
 0x3a3   :  { %2187 = vmatprep.subr.bf16.mxu0 %v2786_v57 }
 0x3a6   :  { %2188 = vmatpush1.bf16.msra.mxu0 %v2784_v63  ;;  %v1653_v63 = vsel %vm1052_vm1, %v1649_v17, %v1645_v49 }
 0x3a7   :  { %2189 = vmatprep.subr.bf16.mxu0 %v2789_v18 }
 0x3aa   :  { %2190 = vmatpush1.bf16.msra.mxu0 %v2787_v28 }
 0x3ab   :  { %2191 = vmatprep.subr.bf16.mxu0 %v2792_v31 }
 0x3ae   :  { %2192 = vmatpush1.bf16.msra.mxu0 %v2790_v32 }
 0x3af   :  { %2193 = vmatprep.subr.bf16.mxu0 %v2795_v39 }
 0x3b2   :  { %2194 = vmatpush1.bf16.msra.mxu0 %v2793_v14  ;;  %v1651_v14 = vsel %vm1052_vm1, %v1645_v49, %v1649_v17 }
 0x3b3   :  { %2195 = vmatprep.subr.bf16.mxu0 %v2798_v21 }
 0x3b6   :  { %2196 = vmatpush1.bf16.msra.mxu0 %v2796_v29 }
 0x41c   :  { %v1511_v16 = vpop.f32.mrb[16].mxu0  ;;  %v1564_v22 = vpop.f32.mrb[28].mxu1 }
 0x41d   :  { %v1520_v8 = vmul.f32 %v1511_v16, %v3196_v46  ;;  %v1585_v24 = vmul.f32 %v3560_v62, %v1564_v22  ;;  %v1513_v52 = vpop.f32.mrb[17].mxu0  ;;  %v1566_v35 = vpop.f32.mrb[29].mxu1  ;;  %v1720_v16 = vsel %vm1112_vm2, %v1714_v37, %v1718_v15 }
 0x41e   :  { %v1521_v33 = vmul.f32 %v1513_v52, %v3210_v60  ;;  %v1586_v40 = vmul.f32 %v1581_v10, %v1566_v35  ;;  %v1515_v41 = vpop.f32.mrb[18].mxu0  ;;  %v1568_v42 = vpop.f32.mrb[30].mxu1 }
 0x41f   :  { %v1589_v7 = vadd.f32 %v1585_v24, %v1520_v8  ;;  %v1522_v45 = vmul.f32 %v1515_v41, %v3198_v47  ;;  %v1587_v11 = vmul.f32 %v3569_v44, %v1568_v42  ;;  %v1517_v54 = vpop.f32.mrb[19].mxu0  ;;  %v1570_v0 = vpop.f32.mrb[31].mxu1 }
 0x420   :  { %v1590_v2 = vadd.f32 %v1586_v40, %v1521_v33  ;;  %v1523_v4 = vmul.f32 %v1517_v54, %v3212_v61  ;;  %v1588_v5 = vmul.f32 %v1582_v1, %v1570_v0 }
 0x421   :  { %v1591_v9 = vadd.f32 %v1587_v11, %v1522_v45 }
 0x422   :  { %v1592_v13 = vadd.f32 %v1588_v5, %v1523_v4 }
 0x42c   :  { %v1633_v20 = vpop.f32.mrb[20].mxu0  ;;  %v1702_v26 = vpop.f32.mrb[32].mxu1 }
 0x42d   :  { %v1654_v27 = vmul.f32 %v1652_v23, %v1633_v20  ;;  %v1635_v50 = vpop.f32.mrb[21].mxu0  ;;  %v1704_v53 = vpop.f32.mrb[33].mxu1  ;;  %v1723_v31 = vmul.f32 %v3582_v6, %v1702_v26 }
 0x42e   :  { %v1655_v30 = vmul.f32 %v1650_v51, %v1635_v50  ;;  %v1637_v57 = vpop.f32.mrb[22].mxu0  ;;  %v1706_v18 = vpop.f32.mrb[34].mxu1  ;;  %v1724_v43 = vmul.f32 %v1719_v48, %v1704_v53 }
 0x42f   :  { %v1658_v28 = vadd.f32 %v1654_v27, %v1589_v7  ;;  %v1656_v32 = vmul.f32 %v1653_v63, %v1637_v57  ;;  %v1639_v39 = vpop.f32.mrb[23].mxu0  ;;  %v1708_v21 = vpop.f32.mrb[35].mxu1  ;;  %v1725_v25 = vmul.f32 %v1722_v34, %v1706_v18 }
 0x430   :  { %v1659_v29 = vadd.f32 %v1655_v30, %v1590_v2  ;;  %v1657_v36 = vmul.f32 %v1651_v14, %v1639_v39  ;;  %v1726_v24 = vmul.f32 %v1720_v16, %v1708_v21 }
 0x431   :  { %v1727_v38 = vadd.f32 %v1723_v31, %v1658_v28  ;;  %v1660_v3 = vadd.f32 %v1656_v32, %v1591_v9 }
 0x432   :  { %v1728_v22 = vadd.f32 %v1724_v43, %v1659_v29  ;;  %v1661_v8 = vadd.f32 %v1657_v36, %v1592_v13 }
 0x433   :  { %v1729_v52 = vadd.f32 %v1725_v25, %v1660_v3 }
 0x434   :  { %v1730_v35 = vadd.f32 %v1726_v24, %v1661_v8 }
 0x43c   :  { %v1771_v33 = vpop.f32.mrb[24].mxu0  ;;  %v1828_v49 = vpop.f32.mrb[36].mxu1 }
 0x43d   :  { %v1780_v40 = vmul.f32 %v1771_v33, %v3210_v60  ;;  %v1773_v41 = vpop.f32.mrb[25].mxu0  ;;  %v1830_v42 = vpop.f32.mrb[37].mxu1  ;;  %v1837_v0 = vmul.f32 %v1828_v49, %v1581_v10 }
 0x43e   :  { %v1781_v7 = vmul.f32 %v1773_v41, %v3196_v46  ;;  %v1775_v45 = vpop.f32.mrb[26].mxu0  ;;  %v1832_v11 = vpop.f32.mrb[38].mxu1  ;;  %v1838_v5 = vmul.f32 %v1830_v42, %v3560_v62 }
 0x43f   :  { %v1784_v54 = vadd.f32 %v1780_v40, %v1727_v38  ;;  %v1782_v58 = vmul.f32 %v1775_v45, %v3212_v61  ;;  %v1777_v37 = vpop.f32.mrb[27].mxu0  ;;  %v1834_v2 = vpop.f32.mrb[39].mxu1  ;;  %v1839_v60 = vmul.f32 %v1832_v11, %v1582_v1 }
 0x440   :  { %v1785_v4 = vadd.f32 %v1781_v7, %v1728_v22  ;;  %v1783_v9 = vmul.f32 %v1777_v37, %v3198_v47  ;;  %v1840_v46 = vmul.f32 %v1834_v2, %v3569_v44 }
 0x441   :  { %v1841_v13 = vadd.f32 %v1837_v0, %v1784_v54  ;;  %v1786_v17 = vadd.f32 %v1782_v58, %v1729_v52 }
 0x442   :  { %v1842_v12 = vadd.f32 %v1838_v5, %v1785_v4  ;;  %v1787_v15 = vadd.f32 %v1783_v9, %v1730_v35 }
 0x443   :  { %v1843_v19 = vadd.f32 %v1839_v60, %v1786_v17 }
 0x444   :  { %v1844_v20 = vadd.f32 %v1840_v46, %v1787_v15 }
 0x44c   :  { %v1885_v26 = vpop.f32.mrb[28].mxu0  ;;  %v1942_v10 = vpop.f32.mrb[40].mxu1 }
 0x44d   :  { %v1894_v27 = vmul.f32 %v1885_v26, %v1650_v51  ;;  %v1887_v61 = vpop.f32.mrb[29].mxu0  ;;  %v1944_v50 = vpop.f32.mrb[41].mxu1  ;;  %v1951_v18 = vmul.f32 %v1942_v10, %v1719_v48  ;;  %v1993_v48 = vld [vmem:[%s3627_s6] sm:$0x3]  ;;  %s2879_s6 = scalar_lea.vmem %s2218_s13, 512 }
 0x44e   :  { %v1895_v53 = vmul.f32 %v1887_v61, %v1652_v23  ;;  %v1889_v30 = vpop.f32.mrb[30].mxu0  ;;  %v1946_v57 = vpop.f32.mrb[42].mxu1  ;;  %v1952_v32 = vmul.f32 %v1944_v50, %v3582_v6  ;;  %v1998_v6 = vrot.slane %v1993_v48, %v162_v56  ;;  %p2880_p2 = scmp.ne.s32.totalorder %s2218_s13, %s2879_s6  ;;  %p2885_p4 = scmp.lt.s32.totalorder %s2879_s6, %s2879_s6 }
 0x44f   :  { %v1898_v62 = vadd.f32 %v1894_v27, %v1841_v13  ;;  %v1896_v47 = vmul.f32 %v1889_v30, %v1651_v14  ;;  %v1891_v28 = vpop.f32.mrb[31].mxu0  ;;  %v1948_v31 = vpop.f32.mrb[43].mxu1  ;;  %v1953_v29 = vmul.f32 %v1946_v57, %v1720_v16 }
 0x450   :  { %v1899_v1 = vadd.f32 %v1895_v53, %v1842_v12  ;;  %v1897_v39 = vmul.f32 %v1891_v28, %v1653_v63  ;;  %v1954_v51 = vmul.f32 %v1948_v31, %v1722_v34  ;;  %v2002_v63 = vrot.slane %v1993_v48, %v166_v59  ;;  %p2886_p5 = por %p2885_p4, %p2884_p3 }
 0x451   :  { %v1955_v44 = vadd.f32 %v1951_v18, %v1898_v62  ;;  %v1900_v21 = vadd.f32 %v1896_v47, %v1843_v19 }
 0x452   :  { %v1956_v43 = vadd.f32 %v1952_v32, %v1899_v1  ;;  %v1901_v36 = vadd.f32 %v1897_v39, %v1844_v20  ;;  %p2887_p6 = pnand %p2886_p5, %p2880_p2 }
 0x453   :  { %v1957_v38 = vadd.f32 %v1953_v29, %v1900_v21 }
 0x454   :  { %v1958_v3 = vadd.f32 %v1954_v51, %v1901_v36 }
 0x455   :  { %v1959_v23 = vpack.c.bf16 %v1957_v38, %v1955_v44 }
 0x456   :  { %v1960_v25 = vpack.c.bf16 %v1958_v3, %v1956_v43 }
 0x458   :  { %2197 = vmatprep.mubr.bf16.mxu0 %v1960_v25 }
 0x459   :  { %2198 = vmatmul.mubr.bf16.vlgmr.msra.gmra.mrb[32].mxu0 %v1959_v23 }
 0x52c   :  { %v2199_v14 = vpop.f32.mrb[32].mxu0 }
 0x52d   :  { %v2200_v16 = vadd.f32 %v2199_v14, %v1998_v6  ;;  %v2201_v22 = vpop.f32.mrb[33].mxu0 }
 0x52e   :  { %v2202_v34 = vadd.f32 %v2201_v22, %v2002_v63  ;;  %v2203_v8 = vpop.f32.mrb[34].mxu0 }
 0x52f   :  { %2208 = vst [vmem:[#allocation7] sm:$0xff] %v2200_v16  ;;  %v2204_v24 = vadd.f32 %v2203_v8, %v1998_v6  ;;  %v2205_v52 = vpop.f32.mrb[35].mxu0 }
 0x530   :  { %2209 = vst [vmem:[#allocation7 + $0x8] sm:$0xff] %v2202_v34  ;;  %v2206_v35 = vadd.f32 %v2205_v52, %v2002_v63 }
 0x531   :  { %2210 = vst [vmem:[#allocation7 + $0x10] sm:$0xff] %v2204_v24 }
 0x532   :  { %2211 = vst [vmem:[#allocation7 + $0x18] sm:$0xff] %v2206_v35 }
 0x533   :  { %2890 = shalt.err (!%p2887_p6)
}
 0x534   :  { %s2891_s15 = scalar_lea.hbm %s3628_s7, 512 }
 0x535   :  { %p2892_p7 = scmp.ne.s32.totalorder %s3628_s7, %s2891_s15  ;;  %p2895_p8 = scmp.lt.u32.totalorder %s2891_s15, %s3628_s7 }
 0x537   :  { %p2897_p9 = pnand %p2895_p8, %p2892_p7 }
 0x539   :  { %2900 = shalt.err (!%p2897_p9)
}
 0x53a   :  { %s2918_s18 = smov 256   ;;  %s2919_s19 = smov 16  }
 0x53b   :  { %2223 = dma.vmem_to_hbm [thread:$0]  %s2218_s13, 512, %s3628_s7, [#allocation4], %s2918_s18, %s2918_s18, %s2919_s19  }
 0x53c   :  { %2905 = dma.done.wait [#allocation4], 512  }
 0x53d   :  { %2906 = vsyncadd [#allocation4], 4294966784 }
 0x53e   :  { %2227 = vsyncpa [#allocation3], 1 }
 0x53f   :  { %2228 = vsyncpa [#allocation6], 1 }
 0x540   :  { %2229 = vsyncpa [#allocation4], 1 }

</bundles_post_ra>
